<compile_context>
chip_gen: v6e
topology: v6e:2x2x1
jax: 0.10.0
libtpu: 0.0.40
codegen_flags: <defaults>
</compile_context>

<pallas_src>
import math

import jax
import jax.numpy as jnp
from jax.experimental import pallas as pl
from jax.experimental.pallas import tpu as pltpu

# ---------------- scaled-down bert-base-uncased config ----------------
VOCAB = 128
HIDDEN = 32
LAYERS = 2
HEADS = 4
HEAD_DIM = HIDDEN // HEADS
INTERMEDIATE = 4 * HIDDEN
MAX_POS = 16
TYPE_VOCAB = 2
LN_EPS = 1e-12                      # BERT LayerNorm eps
SCALE = 1.0 / math.sqrt(HEAD_DIM)   # folded into wqkv/bqkv Q columns at init

# ---------------- packed small-parameter slab layout (f32, lane-dense) ----------------
SCAL_W = max(INTERMEDIATE, 3 * HIDDEN, 128)          # 128 lanes
ROW_EMB_G, ROW_EMB_B = 0, 1
ROWS_PER_LAYER = 8
# per-layer row offsets inside the slab
L_BQKV, L_BO, L_LN1G, L_LN1B, L_BI, L_BO2, L_LN2G, L_LN2B = range(ROWS_PER_LAYER)
ROW_POOL_B = 2 + ROWS_PER_LAYER * LAYERS
ROW_MOOD_W = ROW_POOL_B + 1
ROW_MOOD_B = ROW_POOL_B + 2
N_SCAL_ROWS = ((ROW_MOOD_B + 1 + 7) // 8) * 8         # pad rows to sublane multiple


def _lrow(l, k):
    return 2 + l * ROWS_PER_LAYER + k


# ---------------------------------------------------------------------
# In-kernel helpers
# ---------------------------------------------------------------------
def _gelu_tanh(x):
    # TODO(synk): HF BERT "gelu" is the exact erf-based GELU; tanh approximation
    # kept here for Mosaic portability (small systematic deviation).
    c = math.sqrt(2.0 / math.pi)
    return 0.5 * x * (1.0 + jnp.tanh(c * (x + 0.044715 * x * x * x)))


def _layernorm(x, g, b):
    mean = jnp.mean(x, axis=-1, keepdims=True)
    var = jnp.mean(jnp.square(x - mean), axis=-1, keepdims=True)
    return (x - mean) * jax.lax.rsqrt(var + LN_EPS) * g + b


# NT dot_general dims: contract last dim of both operands (q @ k^T without a transpose)
_NT_DIMS = (((1,), (1,)), ((), ()))


# ---------------------------------------------------------------------
# Fused forward kernel: embeddings-LN -> encoder layers -> pooler -> head
# ---------------------------------------------------------------------
def _make_fused_kernel(B, S):
    BS = B * S

    def kernel(x_ref, kvalid_ref, scal_ref,
               wqkv_ref, wo_ref, wi_ref, wo2_ref, pool_w_ref, o_ref):
        # one load of the packed small-parameter slab; everything below is a
        # static (zero-cost-ish) slice of it
        scal = scal_ref[...]                                   # (N_SCAL_ROWS, 128) f32

        def srow(r, n):
            return scal[r:r + 1, :n]                           # (1, n) broadcast row

        # --- additive attention mask, built ONCE in-kernel (item 6) ---
        # packed-sequence block-diagonal structure (no cross-sample attention)
        # combined with the key-padding mask.
        ri = jax.lax.broadcasted_iota(jnp.int32, (BS, BS), 0).astype(jnp.float32)
        ci = jax.lax.broadcasted_iota(jnp.int32, (BS, BS), 1).astype(jnp.float32)
        same_sample = jnp.floor(ri * (1.0 / S)) == jnp.floor(ci * (1.0 / S))
        key_valid = kvalid_ref[...] > 0.5                      # (1, BS) bool
        addmask = jnp.where(jnp.logical_and(same_sample, key_valid), 0.0, -1e9)

        # --- embedding LayerNorm (residual-free path) ---
        h = _layernorm(x_ref[...], srow(ROW_EMB_G, HIDDEN), srow(ROW_EMB_B, HIDDEN))

        for l in range(LAYERS):
            # --- fused QKV projection: one bf16 (H, 3H) matmul, f32 accum ---
            # (1/sqrt(head_dim) already folded into the Q columns / Q bias)
            qkv = jnp.dot(h.astype(jnp.bfloat16), wqkv_ref[l],
                          preferred_element_type=jnp.float32) + srow(_lrow(l, L_BQKV), 3 * HIDDEN)

            # --- packed-sequence attention: everything 2-D, no per-head reshapes,
            #     no per-head mask broadcast, softmax/mask math in f32 ---
            ctx_parts = []
            for hh in range(HEADS):
                lo = hh * HEAD_DIM
                q = qkv[:, lo:lo + HEAD_DIM].astype(jnp.bfloat16)                       # (BS, Dh)
                k = qkv[:, HIDDEN + lo:HIDDEN + lo + HEAD_DIM].astype(jnp.bfloat16)     # (BS, Dh)
                v = qkv[:, 2 * HIDDEN + lo:2 * HIDDEN + lo + HEAD_DIM].astype(jnp.bfloat16)

                s = jax.lax.dot_general(q, k, _NT_DIMS,
                                        preferred_element_type=jnp.float32)             # (BS, BS)
                s = s + addmask
                s = s - jnp.max(s, axis=-1, keepdims=True)
                p = jnp.exp(s)
                p = p * pl.reciprocal(jnp.sum(p, axis=-1, keepdims=True), approx=True)
                ctx_parts.append(jnp.dot(p.astype(jnp.bfloat16), v,
                                         preferred_element_type=jnp.float32))           # (BS, Dh)
            # one concatenate per layer -> contiguous (BS, H) ctx feeding a single
            # (BS,H)@(H,H) output-projection MXU dispatch
            ctx = jnp.concatenate(ctx_parts, axis=-1)

            attn = jnp.dot(ctx.astype(jnp.bfloat16), wo_ref[l],
                           preferred_element_type=jnp.float32) + srow(_lrow(l, L_BO), HIDDEN)
            h = _layernorm(attn + h, srow(_lrow(l, L_LN1G), HIDDEN), srow(_lrow(l, L_LN1B), HIDDEN))

            # --- feed-forward block ---
            ffn = jnp.dot(h.astype(jnp.bfloat16), wi_ref[l],
                          preferred_element_type=jnp.float32) + srow(_lrow(l, L_BI), INTERMEDIATE)
            ffn = _gelu_tanh(ffn)
            ffn = jnp.dot(ffn.astype(jnp.bfloat16), wo2_ref[l],
                          preferred_element_type=jnp.float32) + srow(_lrow(l, L_BO2), HIDDEN)
            h = _layernorm(ffn + h, srow(_lrow(l, L_LN2G), HIDDEN), srow(_lrow(l, L_LN2B), HIDDEN))

        # --- pooler: tanh(dense(CLS rows)); nn.Dropout(0.3) is identity at inference ---
        cls = h.reshape(B, S, HIDDEN)[:, 0, :]                                          # (B, H)
        pooled = jnp.tanh(jnp.dot(cls.astype(jnp.bfloat16), pool_w_ref[...],
                                  preferred_element_type=jnp.float32) + srow(ROW_POOL_B, HIDDEN))

        # --- mood head: sigmoid(Linear(H, 1)) * 4 + 1; N=1 done as a lane reduce ---
        logits = (jnp.sum(pooled * srow(ROW_MOOD_W, HIDDEN), axis=-1, keepdims=True)
                  + scal[ROW_MOOD_B:ROW_MOOD_B + 1, 0:1])
        o_ref[...] = (jax.nn.sigmoid(logits) * 4.0 + 1.0).astype(o_ref.dtype)

    return kernel


def _full_spec(shape):
    zeros = (0,) * len(shape)
    return pl.BlockSpec(shape, lambda i, _z=zeros: _z)


# ---------------------------------------------------------------------
# Parameters (deterministic synthetic init; no checkpoint loading)
# ---------------------------------------------------------------------
def init_params(key):
    keys = iter(jax.random.split(key, 32))

    def nrm(shape, scale=0.02):
        return scale * jax.random.normal(next(keys), shape, jnp.float32)

    L, H, I = LAYERS, HIDDEN, INTERMEDIATE

    # --- bf16 MXU weights; fold 1/sqrt(head_dim) into Q columns & Q bias (item 3) ---
    wqkv = nrm((L, H, 3 * H))
    wqkv = wqkv.at[:, :, :H].multiply(SCALE)
    bqkv = nrm((L, 3 * H))
    bqkv = bqkv.at[:, :H].multiply(SCALE)
    wo, bo = nrm((L, H, H)), nrm((L, H))
    wi, bi = nrm((L, H, I)), nrm((L, I))
    wo2, bo2 = nrm((L, I, H)), nrm((L, H))
    pool_w, pool_b = nrm((H, H)), nrm((H,))
    mood_w, mood_b = nrm((H,)), nrm((1,))

    # --- pack every small f32 vector into ONE lane-dense slab (item 4) ---
    scal = jnp.zeros((N_SCAL_ROWS, SCAL_W), jnp.float32)
    scal = scal.at[ROW_EMB_G, :H].set(jnp.ones((H,), jnp.float32))
    scal = scal.at[ROW_EMB_B, :H].set(jnp.zeros((H,), jnp.float32))
    for l in range(L):
        scal = scal.at[_lrow(l, L_BQKV), :3 * H].set(bqkv[l])
        scal = scal.at[_lrow(l, L_BO), :H].set(bo[l])
        scal = scal.at[_lrow(l, L_LN1G), :H].set(jnp.ones((H,), jnp.float32))
        scal = scal.at[_lrow(l, L_LN1B), :H].set(jnp.zeros((H,), jnp.float32))
        scal = scal.at[_lrow(l, L_BI), :I].set(bi[l])
        scal = scal.at[_lrow(l, L_BO2), :H].set(bo2[l])
        scal = scal.at[_lrow(l, L_LN2G), :H].set(jnp.ones((H,), jnp.float32))
        scal = scal.at[_lrow(l, L_LN2B), :H].set(jnp.zeros((H,), jnp.float32))
    scal = scal.at[ROW_POOL_B, :H].set(pool_b)
    scal = scal.at[ROW_MOOD_W, :H].set(mood_w)
    scal = scal.at[ROW_MOOD_B, 0].set(mood_b[0])

    return {
        "word_emb": nrm((VOCAB, H)),
        "pos_emb": nrm((MAX_POS, H)),
        "type_emb": nrm((TYPE_VOCAB, H)),
        "scal": scal,                                   # packed small params, f32
        "wqkv": wqkv.astype(jnp.bfloat16),
        "wo": wo.astype(jnp.bfloat16),
        "wi": wi.astype(jnp.bfloat16),
        "wo2": wo2.astype(jnp.bfloat16),
        "pool_w": pool_w.astype(jnp.bfloat16),
    }


# ---------------------------------------------------------------------
# MoodBert forward (inference semantics: dropout layers are identity)
# ---------------------------------------------------------------------
def mood_bert_forward(params, input_ids, attention_mask):
    B, S = input_ids.shape

    # ---- embeddings: table gathers are XLA glue; everything else is one fused kernel ----
    x = (jnp.take(params["word_emb"], input_ids, axis=0)
         + params["pos_emb"][:S][None, :, :]
         + params["type_emb"][0][None, None, :]).reshape(B * S, HIDDEN)

    # compact key-validity vector; the (BS, BS) additive mask is built in-kernel (item 6)
    kvalid = attention_mask.astype(jnp.float32).reshape(1, B * S)

    operands = (x, kvalid, params["scal"],
                params["wqkv"], params["wo"], params["wi"], params["wo2"],
                params["pool_w"])

    return pl.pallas_call(
        _make_fused_kernel(B, S),
        out_shape=jax.ShapeDtypeStruct((B, 1), jnp.float32),
        grid=(1,),
        in_specs=[_full_spec(op.shape) for op in operands],
        out_specs=pl.BlockSpec((B, 1), lambda i: (0, 0)),
        compiler_params=pltpu.CompilerParams(
            dimension_semantics=("arbitrary",),
            # explicit budget: safe on v5e/v6e (128 MiB) and v7x (64 MiB physical)
            vmem_limit_bytes=32 * 1024 * 1024),
    )(*operands)                                                   # (B, 1)


if __name__ == "__main__":
    key = jax.random.PRNGKey(0)
    kp, kids = jax.random.split(key)
    params = init_params(kp)

    B, S = 2, 8
    input_ids = jax.random.randint(kids, (B, S), 0, VOCAB, dtype=jnp.int32)
    attention_mask = jnp.array([[1, 1, 1, 1, 1, 1, 1, 1],
                                [1, 1, 1, 1, 1, 1, 0, 0]], dtype=jnp.int32)

    out = jax.jit(mood_bert_forward)(params, input_ids, attention_mask)
    out = jax.block_until_ready(out)

    assert out.shape == (B, 1)
    assert bool(jnp.all((out >= 1.0) & (out <= 5.0)))
    print("KERNEL_OK")
</pallas_src>

<mosaic_0001>
module attributes {stable_mosaic.version = 11 : i64} {
  func.func @kernel(%arg0: i32, %arg1: memref<16x32xf32, #tpu.memory_space<vmem>>, %arg2: memref<1x16xf32, #tpu.memory_space<vmem>>, %arg3: memref<24x128xf32, #tpu.memory_space<vmem>>, %arg4: memref<2x32x96xbf16, #tpu.memory_space<vmem>>, %arg5: memref<2x32x32xbf16, #tpu.memory_space<vmem>>, %arg6: memref<2x32x128xbf16, #tpu.memory_space<vmem>>, %arg7: memref<2x128x32xbf16, #tpu.memory_space<vmem>>, %arg8: memref<32x32xbf16, #tpu.memory_space<vmem>>, %arg9: memref<2x1xf32, #tpu.memory_space<vmem>>) attributes {dimension_semantics = [#tpu.dimension_semantics<arbitrary>], iteration_bounds = array<i64: 1>, scalar_prefetch = 0 : i64, scratch_operands = 0 : i64, tpu.core_type = #tpu.core_type<tc>, window_params = [{pipeline_mode = #tpu.pipeline_mode<synchronous>, transform_indices = @transform_0, window_bounds = array<i64: 16, 32>}, {pipeline_mode = #tpu.pipeline_mode<synchronous>, transform_indices = @transform_1, window_bounds = array<i64: 1, 16>}, {pipeline_mode = #tpu.pipeline_mode<synchronous>, transform_indices = @transform_2, window_bounds = array<i64: 24, 128>}, {pipeline_mode = #tpu.pipeline_mode<synchronous>, transform_indices = @transform_3, window_bounds = array<i64: 2, 32, 96>}, {pipeline_mode = #tpu.pipeline_mode<synchronous>, transform_indices = @transform_4, window_bounds = array<i64: 2, 32, 32>}, {pipeline_mode = #tpu.pipeline_mode<synchronous>, transform_indices = @transform_5, window_bounds = array<i64: 2, 32, 128>}, {pipeline_mode = #tpu.pipeline_mode<synchronous>, transform_indices = @transform_6, window_bounds = array<i64: 2, 128, 32>}, {pipeline_mode = #tpu.pipeline_mode<synchronous>, transform_indices = @transform_7, window_bounds = array<i64: 32, 32>}, {pipeline_mode = #tpu.pipeline_mode<synchronous>, transform_indices = @transform_8, window_bounds = array<i64: 2, 1>}]} {
    %c0 = arith.constant 0 : index
    %c0_0 = arith.constant 0 : index
    %0 = vector.load %arg3[%c0, %c0_0] : memref<24x128xf32, #tpu.memory_space<vmem>>, vector<24x128xf32>
    %1 = tpu.iota {dimensions = array<i32: 0>} : vector<16x16xi32>
    %2 = arith.sitofp %1 : vector<16x16xi32> to vector<16x16xf32>
    %3 = tpu.iota {dimensions = array<i32: 1>} : vector<16x16xi32>
    %4 = arith.sitofp %3 : vector<16x16xi32> to vector<16x16xf32>
    %cst = arith.constant 1.250000e-01 : f32
    %5 = vector.broadcast %cst : f32 to vector<16x16xf32>
    %6 = arith.mulf %2, %5 : vector<16x16xf32>
    %7 = math.floor %6 : vector<16x16xf32>
    %cst_1 = arith.constant 1.250000e-01 : f32
    %8 = vector.broadcast %cst_1 : f32 to vector<16x16xf32>
    %9 = arith.mulf %4, %8 : vector<16x16xf32>
    %10 = math.floor %9 : vector<16x16xf32>
    %11 = arith.cmpf oeq, %7, %10 : vector<16x16xf32>
    %c0_2 = arith.constant 0 : index
    %c0_3 = arith.constant 0 : index
    %12 = vector.load %arg2[%c0_2, %c0_3] : memref<1x16xf32, #tpu.memory_space<vmem>>, vector<1x16xf32>
    %cst_4 = arith.constant 5.000000e-01 : f32
    %13 = vector.broadcast %cst_4 : f32 to vector<1x16xf32>
    %14 = arith.cmpf ogt, %12, %13 : vector<1x16xf32>
    %15 = vector.broadcast %14 : vector<1x16xi1> to vector<16x16xi1>
    %16 = arith.andi %11, %15 : vector<16x16xi1>
    %cst_5 = arith.constant 0.000000e+00 : f32
    %cst_6 = arith.constant -1.000000e+09 : f32
    %17 = vector.broadcast %cst_5 : f32 to vector<16x16xf32>
    %18 = vector.broadcast %cst_6 : f32 to vector<16x16xf32>
    %19 = arith.select %16, %17, %18 : vector<16x16xi1>, vector<16x16xf32>
    %c0_7 = arith.constant 0 : index
    %c0_8 = arith.constant 0 : index
    %20 = vector.load %arg1[%c0_7, %c0_8] : memref<16x32xf32, #tpu.memory_space<vmem>>, vector<16x32xf32>
    %21 = vector.extract_strided_slice %0 {offsets = [0, 0], sizes = [1, 32], strides = [1, 1]} : vector<24x128xf32> to vector<1x32xf32>
    %22 = vector.extract_strided_slice %0 {offsets = [1, 0], sizes = [1, 32], strides = [1, 1]} : vector<24x128xf32> to vector<1x32xf32>
    %cst_9 = arith.constant dense<0.000000e+00> : vector<16xf32>
    %23 = vector.multi_reduction <add>, %20, %cst_9 [1] : vector<16x32xf32> to vector<16xf32>
    %24 = vector.shape_cast %23 : vector<16xf32> to vector<16x1xf32>
    %cst_10 = arith.constant 3.200000e+01 : f32
    %25 = vector.broadcast %cst_10 : f32 to vector<16x1xf32>
    %26 = arith.divf %24, %25 : vector<16x1xf32>
    %27 = vector.broadcast %26 : vector<16x1xf32> to vector<16x32xf32>
    %28 = arith.subf %20, %27 : vector<16x32xf32>
    %29 = arith.mulf %28, %28 : vector<16x32xf32>
    %cst_11 = arith.constant dense<0.000000e+00> : vector<16xf32>
    %30 = vector.multi_reduction <add>, %29, %cst_11 [1] : vector<16x32xf32> to vector<16xf32>
    %31 = vector.shape_cast %30 : vector<16xf32> to vector<16x1xf32>
    %cst_12 = arith.constant 3.200000e+01 : f32
    %32 = vector.broadcast %cst_12 : f32 to vector<16x1xf32>
    %33 = arith.divf %31, %32 : vector<16x1xf32>
    %34 = vector.broadcast %26 : vector<16x1xf32> to vector<16x32xf32>
    %35 = arith.subf %20, %34 : vector<16x32xf32>
    %cst_13 = arith.constant 9.99999996E-13 : f32
    %36 = vector.broadcast %cst_13 : f32 to vector<16x1xf32>
    %37 = arith.addf %33, %36 : vector<16x1xf32>
    %38 = math.rsqrt %37 : vector<16x1xf32>
    %39 = vector.broadcast %38 : vector<16x1xf32> to vector<16x32xf32>
    %40 = arith.mulf %35, %39 : vector<16x32xf32>
    %41 = vector.broadcast %21 : vector<1x32xf32> to vector<16x32xf32>
    %42 = arith.mulf %40, %41 : vector<16x32xf32>
    %43 = vector.broadcast %22 : vector<1x32xf32> to vector<16x32xf32>
    %44 = arith.addf %42, %43 : vector<16x32xf32>
    %45 = arith.truncf %44 : vector<16x32xf32> to vector<16x32xbf16>
    %c0_14 = arith.constant 0 : index
    %c0_15 = arith.constant 0 : index
    %c0_16 = arith.constant 0 : index
    %46 = vector.load %arg4[%c0_14, %c0_15, %c0_16] : memref<2x32x96xbf16, #tpu.memory_space<vmem>>, vector<1x32x96xbf16>
    %47 = vector.shape_cast %46 : vector<1x32x96xbf16> to vector<32x96xbf16>
    %cst_17 = arith.constant dense<0.000000e+00> : vector<16x96xf32>
    %48 = tpu.matmul %45, %47, %cst_17 {dimension_numbers = #tpu.dot_dimension_numbers<[1], [0], [0], [1], [0, 0, 1, 1], [], []>} : vector<16x32xbf16>, vector<32x96xbf16>, vector<16x96xf32> -> vector<16x96xf32>
    %49 = vector.extract_strided_slice %0 {offsets = [2, 0], sizes = [1, 96], strides = [1, 1]} : vector<24x128xf32> to vector<1x96xf32>
    %50 = vector.broadcast %49 : vector<1x96xf32> to vector<16x96xf32>
    %51 = arith.addf %48, %50 : vector<16x96xf32>
    %52 = vector.extract_strided_slice %51 {offsets = [0, 0], sizes = [16, 8], strides = [1, 1]} : vector<16x96xf32> to vector<16x8xf32>
    %53 = arith.truncf %52 : vector<16x8xf32> to vector<16x8xbf16>
    %54 = vector.extract_strided_slice %51 {offsets = [0, 32], sizes = [16, 8], strides = [1, 1]} : vector<16x96xf32> to vector<16x8xf32>
    %55 = arith.truncf %54 : vector<16x8xf32> to vector<16x8xbf16>
    %56 = vector.extract_strided_slice %51 {offsets = [0, 64], sizes = [16, 8], strides = [1, 1]} : vector<16x96xf32> to vector<16x8xf32>
    %57 = arith.truncf %56 : vector<16x8xf32> to vector<16x8xbf16>
    %cst_18 = arith.constant dense<0.000000e+00> : vector<16x16xf32>
    %58 = tpu.matmul %53, %55, %cst_18 {dimension_numbers = #tpu.dot_dimension_numbers<[1], [1], [0], [0], [0, 0, 1, 0], [], []>} : vector<16x8xbf16>, vector<16x8xbf16>, vector<16x16xf32> -> vector<16x16xf32>
    %59 = arith.addf %58, %19 : vector<16x16xf32>
    %cst_19 = arith.constant dense<0xFF800000> : vector<16xf32>
    %60 = vector.multi_reduction <maximumf>, %59, %cst_19 [1] : vector<16x16xf32> to vector<16xf32>
    %61 = vector.shape_cast %60 : vector<16xf32> to vector<16x1xf32>
    %62 = vector.broadcast %61 : vector<16x1xf32> to vector<16x16xf32>
    %63 = arith.subf %59, %62 : vector<16x16xf32>
    %64 = math.exp %63 : vector<16x16xf32>
    %cst_20 = arith.constant dense<0.000000e+00> : vector<16xf32>
    %65 = vector.multi_reduction <add>, %64, %cst_20 [1] : vector<16x16xf32> to vector<16xf32>
    %66 = vector.shape_cast %65 : vector<16xf32> to vector<16x1xf32>
    %67 = tpu.reciprocal %66 {approx = true} : vector<16x1xf32> -> vector<16x1xf32>
    %68 = vector.broadcast %67 : vector<16x1xf32> to vector<16x16xf32>
    %69 = arith.mulf %64, %68 : vector<16x16xf32>
    %70 = arith.truncf %69 : vector<16x16xf32> to vector<16x16xbf16>
    %cst_21 = arith.constant dense<0.000000e+00> : vector<16x8xf32>
    %71 = tpu.matmul %70, %57, %cst_21 {dimension_numbers = #tpu.dot_dimension_numbers<[1], [0], [0], [1], [0, 0, 1, 1], [], []>} : vector<16x16xbf16>, vector<16x8xbf16>, vector<16x8xf32> -> vector<16x8xf32>
    %72 = vector.extract_strided_slice %51 {offsets = [0, 8], sizes = [16, 8], strides = [1, 1]} : vector<16x96xf32> to vector<16x8xf32>
    %73 = arith.truncf %72 : vector<16x8xf32> to vector<16x8xbf16>
    %74 = vector.extract_strided_slice %51 {offsets = [0, 40], sizes = [16, 8], strides = [1, 1]} : vector<16x96xf32> to vector<16x8xf32>
    %75 = arith.truncf %74 : vector<16x8xf32> to vector<16x8xbf16>
    %76 = vector.extract_strided_slice %51 {offsets = [0, 72], sizes = [16, 8], strides = [1, 1]} : vector<16x96xf32> to vector<16x8xf32>
    %77 = arith.truncf %76 : vector<16x8xf32> to vector<16x8xbf16>
    %cst_22 = arith.constant dense<0.000000e+00> : vector<16x16xf32>
    %78 = tpu.matmul %73, %75, %cst_22 {dimension_numbers = #tpu.dot_dimension_numbers<[1], [1], [0], [0], [0, 0, 1, 0], [], []>} : vector<16x8xbf16>, vector<16x8xbf16>, vector<16x16xf32> -> vector<16x16xf32>
    %79 = arith.addf %78, %19 : vector<16x16xf32>
    %cst_23 = arith.constant dense<0xFF800000> : vector<16xf32>
    %80 = vector.multi_reduction <maximumf>, %79, %cst_23 [1] : vector<16x16xf32> to vector<16xf32>
    %81 = vector.shape_cast %80 : vector<16xf32> to vector<16x1xf32>
    %82 = vector.broadcast %81 : vector<16x1xf32> to vector<16x16xf32>
    %83 = arith.subf %79, %82 : vector<16x16xf32>
    %84 = math.exp %83 : vector<16x16xf32>
    %cst_24 = arith.constant dense<0.000000e+00> : vector<16xf32>
    %85 = vector.multi_reduction <add>, %84, %cst_24 [1] : vector<16x16xf32> to vector<16xf32>
    %86 = vector.shape_cast %85 : vector<16xf32> to vector<16x1xf32>
    %87 = tpu.reciprocal %86 {approx = true} : vector<16x1xf32> -> vector<16x1xf32>
    %88 = vector.broadcast %87 : vector<16x1xf32> to vector<16x16xf32>
    %89 = arith.mulf %84, %88 : vector<16x16xf32>
    %90 = arith.truncf %89 : vector<16x16xf32> to vector<16x16xbf16>
    %cst_25 = arith.constant dense<0.000000e+00> : vector<16x8xf32>
    %91 = tpu.matmul %90, %77, %cst_25 {dimension_numbers = #tpu.dot_dimension_numbers<[1], [0], [0], [1], [0, 0, 1, 1], [], []>} : vector<16x16xbf16>, vector<16x8xbf16>, vector<16x8xf32> -> vector<16x8xf32>
    %92 = vector.extract_strided_slice %51 {offsets = [0, 16], sizes = [16, 8], strides = [1, 1]} : vector<16x96xf32> to vector<16x8xf32>
    %93 = arith.truncf %92 : vector<16x8xf32> to vector<16x8xbf16>
    %94 = vector.extract_strided_slice %51 {offsets = [0, 48], sizes = [16, 8], strides = [1, 1]} : vector<16x96xf32> to vector<16x8xf32>
    %95 = arith.truncf %94 : vector<16x8xf32> to vector<16x8xbf16>
    %96 = vector.extract_strided_slice %51 {offsets = [0, 80], sizes = [16, 8], strides = [1, 1]} : vector<16x96xf32> to vector<16x8xf32>
    %97 = arith.truncf %96 : vector<16x8xf32> to vector<16x8xbf16>
    %cst_26 = arith.constant dense<0.000000e+00> : vector<16x16xf32>
    %98 = tpu.matmul %93, %95, %cst_26 {dimension_numbers = #tpu.dot_dimension_numbers<[1], [1], [0], [0], [0, 0, 1, 0], [], []>} : vector<16x8xbf16>, vector<16x8xbf16>, vector<16x16xf32> -> vector<16x16xf32>
    %99 = arith.addf %98, %19 : vector<16x16xf32>
    %cst_27 = arith.constant dense<0xFF800000> : vector<16xf32>
    %100 = vector.multi_reduction <maximumf>, %99, %cst_27 [1] : vector<16x16xf32> to vector<16xf32>
    %101 = vector.shape_cast %100 : vector<16xf32> to vector<16x1xf32>
    %102 = vector.broadcast %101 : vector<16x1xf32> to vector<16x16xf32>
    %103 = arith.subf %99, %102 : vector<16x16xf32>
    %104 = math.exp %103 : vector<16x16xf32>
    %cst_28 = arith.constant dense<0.000000e+00> : vector<16xf32>
    %105 = vector.multi_reduction <add>, %104, %cst_28 [1] : vector<16x16xf32> to vector<16xf32>
    %106 = vector.shape_cast %105 : vector<16xf32> to vector<16x1xf32>
    %107 = tpu.reciprocal %106 {approx = true} : vector<16x1xf32> -> vector<16x1xf32>
    %108 = vector.broadcast %107 : vector<16x1xf32> to vector<16x16xf32>
    %109 = arith.mulf %104, %108 : vector<16x16xf32>
    %110 = arith.truncf %109 : vector<16x16xf32> to vector<16x16xbf16>
    %cst_29 = arith.constant dense<0.000000e+00> : vector<16x8xf32>
    %111 = tpu.matmul %110, %97, %cst_29 {dimension_numbers = #tpu.dot_dimension_numbers<[1], [0], [0], [1], [0, 0, 1, 1], [], []>} : vector<16x16xbf16>, vector<16x8xbf16>, vector<16x8xf32> -> vector<16x8xf32>
    %112 = vector.extract_strided_slice %51 {offsets = [0, 24], sizes = [16, 8], strides = [1, 1]} : vector<16x96xf32> to vector<16x8xf32>
    %113 = arith.truncf %112 : vector<16x8xf32> to vector<16x8xbf16>
    %114 = vector.extract_strided_slice %51 {offsets = [0, 56], sizes = [16, 8], strides = [1, 1]} : vector<16x96xf32> to vector<16x8xf32>
    %115 = arith.truncf %114 : vector<16x8xf32> to vector<16x8xbf16>
    %116 = vector.extract_strided_slice %51 {offsets = [0, 88], sizes = [16, 8], strides = [1, 1]} : vector<16x96xf32> to vector<16x8xf32>
    %117 = arith.truncf %116 : vector<16x8xf32> to vector<16x8xbf16>
    %cst_30 = arith.constant dense<0.000000e+00> : vector<16x16xf32>
    %118 = tpu.matmul %113, %115, %cst_30 {dimension_numbers = #tpu.dot_dimension_numbers<[1], [1], [0], [0], [0, 0, 1, 0], [], []>} : vector<16x8xbf16>, vector<16x8xbf16>, vector<16x16xf32> -> vector<16x16xf32>
    %119 = arith.addf %118, %19 : vector<16x16xf32>
    %cst_31 = arith.constant dense<0xFF800000> : vector<16xf32>
    %120 = vector.multi_reduction <maximumf>, %119, %cst_31 [1] : vector<16x16xf32> to vector<16xf32>
    %121 = vector.shape_cast %120 : vector<16xf32> to vector<16x1xf32>
    %122 = vector.broadcast %121 : vector<16x1xf32> to vector<16x16xf32>
    %123 = arith.subf %119, %122 : vector<16x16xf32>
    %124 = math.exp %123 : vector<16x16xf32>
    %cst_32 = arith.constant dense<0.000000e+00> : vector<16xf32>
    %125 = vector.multi_reduction <add>, %124, %cst_32 [1] : vector<16x16xf32> to vector<16xf32>
    %126 = vector.shape_cast %125 : vector<16xf32> to vector<16x1xf32>
    %127 = tpu.reciprocal %126 {approx = true} : vector<16x1xf32> -> vector<16x1xf32>
    %128 = vector.broadcast %127 : vector<16x1xf32> to vector<16x16xf32>
    %129 = arith.mulf %124, %128 : vector<16x16xf32>
    %130 = arith.truncf %129 : vector<16x16xf32> to vector<16x16xbf16>
    %cst_33 = arith.constant dense<0.000000e+00> : vector<16x8xf32>
    %131 = tpu.matmul %130, %117, %cst_33 {dimension_numbers = #tpu.dot_dimension_numbers<[1], [0], [0], [1], [0, 0, 1, 1], [], []>} : vector<16x16xbf16>, vector<16x8xbf16>, vector<16x8xf32> -> vector<16x8xf32>
    %132 = tpu.concatenate %71, %91, %111, %131 in 1 : vector<16x8xf32>, vector<16x8xf32>, vector<16x8xf32>, vector<16x8xf32> -> vector<16x32xf32>
    %133 = arith.truncf %132 : vector<16x32xf32> to vector<16x32xbf16>
    %c0_34 = arith.constant 0 : index
    %c0_35 = arith.constant 0 : index
    %c0_36 = arith.constant 0 : index
    %134 = vector.load %arg5[%c0_34, %c0_35, %c0_36] : memref<2x32x32xbf16, #tpu.memory_space<vmem>>, vector<1x32x32xbf16>
    %135 = vector.shape_cast %134 : vector<1x32x32xbf16> to vector<32x32xbf16>
    %cst_37 = arith.constant dense<0.000000e+00> : vector<16x32xf32>
    %136 = tpu.matmul %133, %135, %cst_37 {dimension_numbers = #tpu.dot_dimension_numbers<[1], [0], [0], [1], [0, 0, 1, 1], [], []>} : vector<16x32xbf16>, vector<32x32xbf16>, vector<16x32xf32> -> vector<16x32xf32>
    %137 = vector.extract_strided_slice %0 {offsets = [3, 0], sizes = [1, 32], strides = [1, 1]} : vector<24x128xf32> to vector<1x32xf32>
    %138 = vector.broadcast %137 : vector<1x32xf32> to vector<16x32xf32>
    %139 = arith.addf %136, %138 : vector<16x32xf32>
    %140 = arith.addf %139, %44 : vector<16x32xf32>
    %141 = vector.extract_strided_slice %0 {offsets = [4, 0], sizes = [1, 32], strides = [1, 1]} : vector<24x128xf32> to vector<1x32xf32>
    %142 = vector.extract_strided_slice %0 {offsets = [5, 0], sizes = [1, 32], strides = [1, 1]} : vector<24x128xf32> to vector<1x32xf32>
    %cst_38 = arith.constant dense<0.000000e+00> : vector<16xf32>
    %143 = vector.multi_reduction <add>, %140, %cst_38 [1] : vector<16x32xf32> to vector<16xf32>
    %144 = vector.shape_cast %143 : vector<16xf32> to vector<16x1xf32>
    %cst_39 = arith.constant 3.200000e+01 : f32
    %145 = vector.broadcast %cst_39 : f32 to vector<16x1xf32>
    %146 = arith.divf %144, %145 : vector<16x1xf32>
    %147 = vector.broadcast %146 : vector<16x1xf32> to vector<16x32xf32>
    %148 = arith.subf %140, %147 : vector<16x32xf32>
    %149 = arith.mulf %148, %148 : vector<16x32xf32>
    %cst_40 = arith.constant dense<0.000000e+00> : vector<16xf32>
    %150 = vector.multi_reduction <add>, %149, %cst_40 [1] : vector<16x32xf32> to vector<16xf32>
    %151 = vector.shape_cast %150 : vector<16xf32> to vector<16x1xf32>
    %cst_41 = arith.constant 3.200000e+01 : f32
    %152 = vector.broadcast %cst_41 : f32 to vector<16x1xf32>
    %153 = arith.divf %151, %152 : vector<16x1xf32>
    %154 = vector.broadcast %146 : vector<16x1xf32> to vector<16x32xf32>
    %155 = arith.subf %140, %154 : vector<16x32xf32>
    %cst_42 = arith.constant 9.99999996E-13 : f32
    %156 = vector.broadcast %cst_42 : f32 to vector<16x1xf32>
    %157 = arith.addf %153, %156 : vector<16x1xf32>
    %158 = math.rsqrt %157 : vector<16x1xf32>
    %159 = vector.broadcast %158 : vector<16x1xf32> to vector<16x32xf32>
    %160 = arith.mulf %155, %159 : vector<16x32xf32>
    %161 = vector.broadcast %141 : vector<1x32xf32> to vector<16x32xf32>
    %162 = arith.mulf %160, %161 : vector<16x32xf32>
    %163 = vector.broadcast %142 : vector<1x32xf32> to vector<16x32xf32>
    %164 = arith.addf %162, %163 : vector<16x32xf32>
    %165 = arith.truncf %164 : vector<16x32xf32> to vector<16x32xbf16>
    %c0_43 = arith.constant 0 : index
    %c0_44 = arith.constant 0 : index
    %c0_45 = arith.constant 0 : index
    %166 = vector.load %arg6[%c0_43, %c0_44, %c0_45] : memref<2x32x128xbf16, #tpu.memory_space<vmem>>, vector<1x32x128xbf16>
    %167 = vector.shape_cast %166 : vector<1x32x128xbf16> to vector<32x128xbf16>
    %cst_46 = arith.constant dense<0.000000e+00> : vector<16x128xf32>
    %168 = tpu.matmul %165, %167, %cst_46 {dimension_numbers = #tpu.dot_dimension_numbers<[1], [0], [0], [1], [0, 0, 1, 1], [], []>} : vector<16x32xbf16>, vector<32x128xbf16>, vector<16x128xf32> -> vector<16x128xf32>
    %169 = vector.extract_strided_slice %0 {offsets = [6, 0], sizes = [1, 128], strides = [1, 1]} : vector<24x128xf32> to vector<1x128xf32>
    %170 = vector.broadcast %169 : vector<1x128xf32> to vector<16x128xf32>
    %171 = arith.addf %168, %170 : vector<16x128xf32>
    %cst_47 = arith.constant 5.000000e-01 : f32
    %172 = vector.broadcast %cst_47 : f32 to vector<16x128xf32>
    %173 = arith.mulf %172, %171 : vector<16x128xf32>
    %cst_48 = arith.constant 4.471500e-02 : f32
    %174 = vector.broadcast %cst_48 : f32 to vector<16x128xf32>
    %175 = arith.mulf %174, %171 : vector<16x128xf32>
    %176 = arith.mulf %175, %171 : vector<16x128xf32>
    %177 = arith.mulf %176, %171 : vector<16x128xf32>
    %178 = arith.addf %171, %177 : vector<16x128xf32>
    %cst_49 = arith.constant 0.797884583 : f32
    %179 = vector.broadcast %cst_49 : f32 to vector<16x128xf32>
    %180 = arith.mulf %179, %178 : vector<16x128xf32>
    %181 = math.tanh %180 : vector<16x128xf32>
    %cst_50 = arith.constant 1.000000e+00 : f32
    %182 = vector.broadcast %cst_50 : f32 to vector<16x128xf32>
    %183 = arith.addf %182, %181 : vector<16x128xf32>
    %184 = arith.mulf %173, %183 : vector<16x128xf32>
    %185 = arith.truncf %184 : vector<16x128xf32> to vector<16x128xbf16>
    %c0_51 = arith.constant 0 : index
    %c0_52 = arith.constant 0 : index
    %c0_53 = arith.constant 0 : index
    %186 = vector.load %arg7[%c0_51, %c0_52, %c0_53] : memref<2x128x32xbf16, #tpu.memory_space<vmem>>, vector<1x128x32xbf16>
    %187 = vector.shape_cast %186 : vector<1x128x32xbf16> to vector<128x32xbf16>
    %cst_54 = arith.constant dense<0.000000e+00> : vector<16x32xf32>
    %188 = tpu.matmul %185, %187, %cst_54 {dimension_numbers = #tpu.dot_dimension_numbers<[1], [0], [0], [1], [0, 0, 1, 1], [], []>} : vector<16x128xbf16>, vector<128x32xbf16>, vector<16x32xf32> -> vector<16x32xf32>
    %189 = vector.extract_strided_slice %0 {offsets = [7, 0], sizes = [1, 32], strides = [1, 1]} : vector<24x128xf32> to vector<1x32xf32>
    %190 = vector.broadcast %189 : vector<1x32xf32> to vector<16x32xf32>
    %191 = arith.addf %188, %190 : vector<16x32xf32>
    %192 = arith.addf %191, %164 : vector<16x32xf32>
    %193 = vector.extract_strided_slice %0 {offsets = [8, 0], sizes = [1, 32], strides = [1, 1]} : vector<24x128xf32> to vector<1x32xf32>
    %194 = vector.extract_strided_slice %0 {offsets = [9, 0], sizes = [1, 32], strides = [1, 1]} : vector<24x128xf32> to vector<1x32xf32>
    %cst_55 = arith.constant dense<0.000000e+00> : vector<16xf32>
    %195 = vector.multi_reduction <add>, %192, %cst_55 [1] : vector<16x32xf32> to vector<16xf32>
    %196 = vector.shape_cast %195 : vector<16xf32> to vector<16x1xf32>
    %cst_56 = arith.constant 3.200000e+01 : f32
    %197 = vector.broadcast %cst_56 : f32 to vector<16x1xf32>
    %198 = arith.divf %196, %197 : vector<16x1xf32>
    %199 = vector.broadcast %198 : vector<16x1xf32> to vector<16x32xf32>
    %200 = arith.subf %192, %199 : vector<16x32xf32>
    %201 = arith.mulf %200, %200 : vector<16x32xf32>
    %cst_57 = arith.constant dense<0.000000e+00> : vector<16xf32>
    %202 = vector.multi_reduction <add>, %201, %cst_57 [1] : vector<16x32xf32> to vector<16xf32>
    %203 = vector.shape_cast %202 : vector<16xf32> to vector<16x1xf32>
    %cst_58 = arith.constant 3.200000e+01 : f32
    %204 = vector.broadcast %cst_58 : f32 to vector<16x1xf32>
    %205 = arith.divf %203, %204 : vector<16x1xf32>
    %206 = vector.broadcast %198 : vector<16x1xf32> to vector<16x32xf32>
    %207 = arith.subf %192, %206 : vector<16x32xf32>
    %cst_59 = arith.constant 9.99999996E-13 : f32
    %208 = vector.broadcast %cst_59 : f32 to vector<16x1xf32>
    %209 = arith.addf %205, %208 : vector<16x1xf32>
    %210 = math.rsqrt %209 : vector<16x1xf32>
    %211 = vector.broadcast %210 : vector<16x1xf32> to vector<16x32xf32>
    %212 = arith.mulf %207, %211 : vector<16x32xf32>
    %213 = vector.broadcast %193 : vector<1x32xf32> to vector<16x32xf32>
    %214 = arith.mulf %212, %213 : vector<16x32xf32>
    %215 = vector.broadcast %194 : vector<1x32xf32> to vector<16x32xf32>
    %216 = arith.addf %214, %215 : vector<16x32xf32>
    %217 = arith.truncf %216 : vector<16x32xf32> to vector<16x32xbf16>
    %c1 = arith.constant 1 : index
    %c0_60 = arith.constant 0 : index
    %c0_61 = arith.constant 0 : index
    %218 = vector.load %arg4[%c1, %c0_60, %c0_61] : memref<2x32x96xbf16, #tpu.memory_space<vmem>>, vector<1x32x96xbf16>
    %219 = vector.shape_cast %218 : vector<1x32x96xbf16> to vector<32x96xbf16>
    %cst_62 = arith.constant dense<0.000000e+00> : vector<16x96xf32>
    %220 = tpu.matmul %217, %219, %cst_62 {dimension_numbers = #tpu.dot_dimension_numbers<[1], [0], [0], [1], [0, 0, 1, 1], [], []>} : vector<16x32xbf16>, vector<32x96xbf16>, vector<16x96xf32> -> vector<16x96xf32>
    %221 = vector.extract_strided_slice %0 {offsets = [10, 0], sizes = [1, 96], strides = [1, 1]} : vector<24x128xf32> to vector<1x96xf32>
    %222 = vector.broadcast %221 : vector<1x96xf32> to vector<16x96xf32>
    %223 = arith.addf %220, %222 : vector<16x96xf32>
    %224 = vector.extract_strided_slice %223 {offsets = [0, 0], sizes = [16, 8], strides = [1, 1]} : vector<16x96xf32> to vector<16x8xf32>
    %225 = arith.truncf %224 : vector<16x8xf32> to vector<16x8xbf16>
    %226 = vector.extract_strided_slice %223 {offsets = [0, 32], sizes = [16, 8], strides = [1, 1]} : vector<16x96xf32> to vector<16x8xf32>
    %227 = arith.truncf %226 : vector<16x8xf32> to vector<16x8xbf16>
    %228 = vector.extract_strided_slice %223 {offsets = [0, 64], sizes = [16, 8], strides = [1, 1]} : vector<16x96xf32> to vector<16x8xf32>
    %229 = arith.truncf %228 : vector<16x8xf32> to vector<16x8xbf16>
    %cst_63 = arith.constant dense<0.000000e+00> : vector<16x16xf32>
    %230 = tpu.matmul %225, %227, %cst_63 {dimension_numbers = #tpu.dot_dimension_numbers<[1], [1], [0], [0], [0, 0, 1, 0], [], []>} : vector<16x8xbf16>, vector<16x8xbf16>, vector<16x16xf32> -> vector<16x16xf32>
    %231 = arith.addf %230, %19 : vector<16x16xf32>
    %cst_64 = arith.constant dense<0xFF800000> : vector<16xf32>
    %232 = vector.multi_reduction <maximumf>, %231, %cst_64 [1] : vector<16x16xf32> to vector<16xf32>
    %233 = vector.shape_cast %232 : vector<16xf32> to vector<16x1xf32>
    %234 = vector.broadcast %233 : vector<16x1xf32> to vector<16x16xf32>
    %235 = arith.subf %231, %234 : vector<16x16xf32>
    %236 = math.exp %235 : vector<16x16xf32>
    %cst_65 = arith.constant dense<0.000000e+00> : vector<16xf32>
    %237 = vector.multi_reduction <add>, %236, %cst_65 [1] : vector<16x16xf32> to vector<16xf32>
    %238 = vector.shape_cast %237 : vector<16xf32> to vector<16x1xf32>
    %239 = tpu.reciprocal %238 {approx = true} : vector<16x1xf32> -> vector<16x1xf32>
    %240 = vector.broadcast %239 : vector<16x1xf32> to vector<16x16xf32>
    %241 = arith.mulf %236, %240 : vector<16x16xf32>
    %242 = arith.truncf %241 : vector<16x16xf32> to vector<16x16xbf16>
    %cst_66 = arith.constant dense<0.000000e+00> : vector<16x8xf32>
    %243 = tpu.matmul %242, %229, %cst_66 {dimension_numbers = #tpu.dot_dimension_numbers<[1], [0], [0], [1], [0, 0, 1, 1], [], []>} : vector<16x16xbf16>, vector<16x8xbf16>, vector<16x8xf32> -> vector<16x8xf32>
    %244 = vector.extract_strided_slice %223 {offsets = [0, 8], sizes = [16, 8], strides = [1, 1]} : vector<16x96xf32> to vector<16x8xf32>
    %245 = arith.truncf %244 : vector<16x8xf32> to vector<16x8xbf16>
    %246 = vector.extract_strided_slice %223 {offsets = [0, 40], sizes = [16, 8], strides = [1, 1]} : vector<16x96xf32> to vector<16x8xf32>
    %247 = arith.truncf %246 : vector<16x8xf32> to vector<16x8xbf16>
    %248 = vector.extract_strided_slice %223 {offsets = [0, 72], sizes = [16, 8], strides = [1, 1]} : vector<16x96xf32> to vector<16x8xf32>
    %249 = arith.truncf %248 : vector<16x8xf32> to vector<16x8xbf16>
    %cst_67 = arith.constant dense<0.000000e+00> : vector<16x16xf32>
    %250 = tpu.matmul %245, %247, %cst_67 {dimension_numbers = #tpu.dot_dimension_numbers<[1], [1], [0], [0], [0, 0, 1, 0], [], []>} : vector<16x8xbf16>, vector<16x8xbf16>, vector<16x16xf32> -> vector<16x16xf32>
    %251 = arith.addf %250, %19 : vector<16x16xf32>
    %cst_68 = arith.constant dense<0xFF800000> : vector<16xf32>
    %252 = vector.multi_reduction <maximumf>, %251, %cst_68 [1] : vector<16x16xf32> to vector<16xf32>
    %253 = vector.shape_cast %252 : vector<16xf32> to vector<16x1xf32>
    %254 = vector.broadcast %253 : vector<16x1xf32> to vector<16x16xf32>
    %255 = arith.subf %251, %254 : vector<16x16xf32>
    %256 = math.exp %255 : vector<16x16xf32>
    %cst_69 = arith.constant dense<0.000000e+00> : vector<16xf32>
    %257 = vector.multi_reduction <add>, %256, %cst_69 [1] : vector<16x16xf32> to vector<16xf32>
    %258 = vector.shape_cast %257 : vector<16xf32> to vector<16x1xf32>
    %259 = tpu.reciprocal %258 {approx = true} : vector<16x1xf32> -> vector<16x1xf32>
    %260 = vector.broadcast %259 : vector<16x1xf32> to vector<16x16xf32>
    %261 = arith.mulf %256, %260 : vector<16x16xf32>
    %262 = arith.truncf %261 : vector<16x16xf32> to vector<16x16xbf16>
    %cst_70 = arith.constant dense<0.000000e+00> : vector<16x8xf32>
    %263 = tpu.matmul %262, %249, %cst_70 {dimension_numbers = #tpu.dot_dimension_numbers<[1], [0], [0], [1], [0, 0, 1, 1], [], []>} : vector<16x16xbf16>, vector<16x8xbf16>, vector<16x8xf32> -> vector<16x8xf32>
    %264 = vector.extract_strided_slice %223 {offsets = [0, 16], sizes = [16, 8], strides = [1, 1]} : vector<16x96xf32> to vector<16x8xf32>
    %265 = arith.truncf %264 : vector<16x8xf32> to vector<16x8xbf16>
    %266 = vector.extract_strided_slice %223 {offsets = [0, 48], sizes = [16, 8], strides = [1, 1]} : vector<16x96xf32> to vector<16x8xf32>
    %267 = arith.truncf %266 : vector<16x8xf32> to vector<16x8xbf16>
    %268 = vector.extract_strided_slice %223 {offsets = [0, 80], sizes = [16, 8], strides = [1, 1]} : vector<16x96xf32> to vector<16x8xf32>
    %269 = arith.truncf %268 : vector<16x8xf32> to vector<16x8xbf16>
    %cst_71 = arith.constant dense<0.000000e+00> : vector<16x16xf32>
    %270 = tpu.matmul %265, %267, %cst_71 {dimension_numbers = #tpu.dot_dimension_numbers<[1], [1], [0], [0], [0, 0, 1, 0], [], []>} : vector<16x8xbf16>, vector<16x8xbf16>, vector<16x16xf32> -> vector<16x16xf32>
    %271 = arith.addf %270, %19 : vector<16x16xf32>
    %cst_72 = arith.constant dense<0xFF800000> : vector<16xf32>
    %272 = vector.multi_reduction <maximumf>, %271, %cst_72 [1] : vector<16x16xf32> to vector<16xf32>
    %273 = vector.shape_cast %272 : vector<16xf32> to vector<16x1xf32>
    %274 = vector.broadcast %273 : vector<16x1xf32> to vector<16x16xf32>
    %275 = arith.subf %271, %274 : vector<16x16xf32>
    %276 = math.exp %275 : vector<16x16xf32>
    %cst_73 = arith.constant dense<0.000000e+00> : vector<16xf32>
    %277 = vector.multi_reduction <add>, %276, %cst_73 [1] : vector<16x16xf32> to vector<16xf32>
    %278 = vector.shape_cast %277 : vector<16xf32> to vector<16x1xf32>
    %279 = tpu.reciprocal %278 {approx = true} : vector<16x1xf32> -> vector<16x1xf32>
    %280 = vector.broadcast %279 : vector<16x1xf32> to vector<16x16xf32>
    %281 = arith.mulf %276, %280 : vector<16x16xf32>
    %282 = arith.truncf %281 : vector<16x16xf32> to vector<16x16xbf16>
    %cst_74 = arith.constant dense<0.000000e+00> : vector<16x8xf32>
    %283 = tpu.matmul %282, %269, %cst_74 {dimension_numbers = #tpu.dot_dimension_numbers<[1], [0], [0], [1], [0, 0, 1, 1], [], []>} : vector<16x16xbf16>, vector<16x8xbf16>, vector<16x8xf32> -> vector<16x8xf32>
    %284 = vector.extract_strided_slice %223 {offsets = [0, 24], sizes = [16, 8], strides = [1, 1]} : vector<16x96xf32> to vector<16x8xf32>
    %285 = arith.truncf %284 : vector<16x8xf32> to vector<16x8xbf16>
    %286 = vector.extract_strided_slice %223 {offsets = [0, 56], sizes = [16, 8], strides = [1, 1]} : vector<16x96xf32> to vector<16x8xf32>
    %287 = arith.truncf %286 : vector<16x8xf32> to vector<16x8xbf16>
    %288 = vector.extract_strided_slice %223 {offsets = [0, 88], sizes = [16, 8], strides = [1, 1]} : vector<16x96xf32> to vector<16x8xf32>
    %289 = arith.truncf %288 : vector<16x8xf32> to vector<16x8xbf16>
    %cst_75 = arith.constant dense<0.000000e+00> : vector<16x16xf32>
    %290 = tpu.matmul %285, %287, %cst_75 {dimension_numbers = #tpu.dot_dimension_numbers<[1], [1], [0], [0], [0, 0, 1, 0], [], []>} : vector<16x8xbf16>, vector<16x8xbf16>, vector<16x16xf32> -> vector<16x16xf32>
    %291 = arith.addf %290, %19 : vector<16x16xf32>
    %cst_76 = arith.constant dense<0xFF800000> : vector<16xf32>
    %292 = vector.multi_reduction <maximumf>, %291, %cst_76 [1] : vector<16x16xf32> to vector<16xf32>
    %293 = vector.shape_cast %292 : vector<16xf32> to vector<16x1xf32>
    %294 = vector.broadcast %293 : vector<16x1xf32> to vector<16x16xf32>
    %295 = arith.subf %291, %294 : vector<16x16xf32>
    %296 = math.exp %295 : vector<16x16xf32>
    %cst_77 = arith.constant dense<0.000000e+00> : vector<16xf32>
    %297 = vector.multi_reduction <add>, %296, %cst_77 [1] : vector<16x16xf32> to vector<16xf32>
    %298 = vector.shape_cast %297 : vector<16xf32> to vector<16x1xf32>
    %299 = tpu.reciprocal %298 {approx = true} : vector<16x1xf32> -> vector<16x1xf32>
    %300 = vector.broadcast %299 : vector<16x1xf32> to vector<16x16xf32>
    %301 = arith.mulf %296, %300 : vector<16x16xf32>
    %302 = arith.truncf %301 : vector<16x16xf32> to vector<16x16xbf16>
    %cst_78 = arith.constant dense<0.000000e+00> : vector<16x8xf32>
    %303 = tpu.matmul %302, %289, %cst_78 {dimension_numbers = #tpu.dot_dimension_numbers<[1], [0], [0], [1], [0, 0, 1, 1], [], []>} : vector<16x16xbf16>, vector<16x8xbf16>, vector<16x8xf32> -> vector<16x8xf32>
    %304 = tpu.concatenate %243, %263, %283, %303 in 1 : vector<16x8xf32>, vector<16x8xf32>, vector<16x8xf32>, vector<16x8xf32> -> vector<16x32xf32>
    %305 = arith.truncf %304 : vector<16x32xf32> to vector<16x32xbf16>
    %c1_79 = arith.constant 1 : index
    %c0_80 = arith.constant 0 : index
    %c0_81 = arith.constant 0 : index
    %306 = vector.load %arg5[%c1_79, %c0_80, %c0_81] : memref<2x32x32xbf16, #tpu.memory_space<vmem>>, vector<1x32x32xbf16>
    %307 = vector.shape_cast %306 : vector<1x32x32xbf16> to vector<32x32xbf16>
    %cst_82 = arith.constant dense<0.000000e+00> : vector<16x32xf32>
    %308 = tpu.matmul %305, %307, %cst_82 {dimension_numbers = #tpu.dot_dimension_numbers<[1], [0], [0], [1], [0, 0, 1, 1], [], []>} : vector<16x32xbf16>, vector<32x32xbf16>, vector<16x32xf32> -> vector<16x32xf32>
    %309 = vector.extract_strided_slice %0 {offsets = [11, 0], sizes = [1, 32], strides = [1, 1]} : vector<24x128xf32> to vector<1x32xf32>
    %310 = vector.broadcast %309 : vector<1x32xf32> to vector<16x32xf32>
    %311 = arith.addf %308, %310 : vector<16x32xf32>
    %312 = arith.addf %311, %216 : vector<16x32xf32>
    %313 = vector.extract_strided_slice %0 {offsets = [12, 0], sizes = [1, 32], strides = [1, 1]} : vector<24x128xf32> to vector<1x32xf32>
    %314 = vector.extract_strided_slice %0 {offsets = [13, 0], sizes = [1, 32], strides = [1, 1]} : vector<24x128xf32> to vector<1x32xf32>
    %cst_83 = arith.constant dense<0.000000e+00> : vector<16xf32>
    %315 = vector.multi_reduction <add>, %312, %cst_83 [1] : vector<16x32xf32> to vector<16xf32>
    %316 = vector.shape_cast %315 : vector<16xf32> to vector<16x1xf32>
    %cst_84 = arith.constant 3.200000e+01 : f32
    %317 = vector.broadcast %cst_84 : f32 to vector<16x1xf32>
    %318 = arith.divf %316, %317 : vector<16x1xf32>
    %319 = vector.broadcast %318 : vector<16x1xf32> to vector<16x32xf32>
    %320 = arith.subf %312, %319 : vector<16x32xf32>
    %321 = arith.mulf %320, %320 : vector<16x32xf32>
    %cst_85 = arith.constant dense<0.000000e+00> : vector<16xf32>
    %322 = vector.multi_reduction <add>, %321, %cst_85 [1] : vector<16x32xf32> to vector<16xf32>
    %323 = vector.shape_cast %322 : vector<16xf32> to vector<16x1xf32>
    %cst_86 = arith.constant 3.200000e+01 : f32
    %324 = vector.broadcast %cst_86 : f32 to vector<16x1xf32>
    %325 = arith.divf %323, %324 : vector<16x1xf32>
    %326 = vector.broadcast %318 : vector<16x1xf32> to vector<16x32xf32>
    %327 = arith.subf %312, %326 : vector<16x32xf32>
    %cst_87 = arith.constant 9.99999996E-13 : f32
    %328 = vector.broadcast %cst_87 : f32 to vector<16x1xf32>
    %329 = arith.addf %325, %328 : vector<16x1xf32>
    %330 = math.rsqrt %329 : vector<16x1xf32>
    %331 = vector.broadcast %330 : vector<16x1xf32> to vector<16x32xf32>
    %332 = arith.mulf %327, %331 : vector<16x32xf32>
    %333 = vector.broadcast %313 : vector<1x32xf32> to vector<16x32xf32>
    %334 = arith.mulf %332, %333 : vector<16x32xf32>
    %335 = vector.broadcast %314 : vector<1x32xf32> to vector<16x32xf32>
    %336 = arith.addf %334, %335 : vector<16x32xf32>
    %337 = arith.truncf %336 : vector<16x32xf32> to vector<16x32xbf16>
    %c1_88 = arith.constant 1 : index
    %c0_89 = arith.constant 0 : index
    %c0_90 = arith.constant 0 : index
    %338 = vector.load %arg6[%c1_88, %c0_89, %c0_90] : memref<2x32x128xbf16, #tpu.memory_space<vmem>>, vector<1x32x128xbf16>
    %339 = vector.shape_cast %338 : vector<1x32x128xbf16> to vector<32x128xbf16>
    %cst_91 = arith.constant dense<0.000000e+00> : vector<16x128xf32>
    %340 = tpu.matmul %337, %339, %cst_91 {dimension_numbers = #tpu.dot_dimension_numbers<[1], [0], [0], [1], [0, 0, 1, 1], [], []>} : vector<16x32xbf16>, vector<32x128xbf16>, vector<16x128xf32> -> vector<16x128xf32>
    %341 = vector.extract_strided_slice %0 {offsets = [14, 0], sizes = [1, 128], strides = [1, 1]} : vector<24x128xf32> to vector<1x128xf32>
    %342 = vector.broadcast %341 : vector<1x128xf32> to vector<16x128xf32>
    %343 = arith.addf %340, %342 : vector<16x128xf32>
    %cst_92 = arith.constant 5.000000e-01 : f32
    %344 = vector.broadcast %cst_92 : f32 to vector<16x128xf32>
    %345 = arith.mulf %344, %343 : vector<16x128xf32>
    %cst_93 = arith.constant 4.471500e-02 : f32
    %346 = vector.broadcast %cst_93 : f32 to vector<16x128xf32>
    %347 = arith.mulf %346, %343 : vector<16x128xf32>
    %348 = arith.mulf %347, %343 : vector<16x128xf32>
    %349 = arith.mulf %348, %343 : vector<16x128xf32>
    %350 = arith.addf %343, %349 : vector<16x128xf32>
    %cst_94 = arith.constant 0.797884583 : f32
    %351 = vector.broadcast %cst_94 : f32 to vector<16x128xf32>
    %352 = arith.mulf %351, %350 : vector<16x128xf32>
    %353 = math.tanh %352 : vector<16x128xf32>
    %cst_95 = arith.constant 1.000000e+00 : f32
    %354 = vector.broadcast %cst_95 : f32 to vector<16x128xf32>
    %355 = arith.addf %354, %353 : vector<16x128xf32>
    %356 = arith.mulf %345, %355 : vector<16x128xf32>
    %357 = arith.truncf %356 : vector<16x128xf32> to vector<16x128xbf16>
    %c1_96 = arith.constant 1 : index
    %c0_97 = arith.constant 0 : index
    %c0_98 = arith.constant 0 : index
    %358 = vector.load %arg7[%c1_96, %c0_97, %c0_98] : memref<2x128x32xbf16, #tpu.memory_space<vmem>>, vector<1x128x32xbf16>
    %359 = vector.shape_cast %358 : vector<1x128x32xbf16> to vector<128x32xbf16>
    %cst_99 = arith.constant dense<0.000000e+00> : vector<16x32xf32>
    %360 = tpu.matmul %357, %359, %cst_99 {dimension_numbers = #tpu.dot_dimension_numbers<[1], [0], [0], [1], [0, 0, 1, 1], [], []>} : vector<16x128xbf16>, vector<128x32xbf16>, vector<16x32xf32> -> vector<16x32xf32>
    %361 = vector.extract_strided_slice %0 {offsets = [15, 0], sizes = [1, 32], strides = [1, 1]} : vector<24x128xf32> to vector<1x32xf32>
    %362 = vector.broadcast %361 : vector<1x32xf32> to vector<16x32xf32>
    %363 = arith.addf %360, %362 : vector<16x32xf32>
    %364 = arith.addf %363, %336 : vector<16x32xf32>
    %365 = vector.extract_strided_slice %0 {offsets = [16, 0], sizes = [1, 32], strides = [1, 1]} : vector<24x128xf32> to vector<1x32xf32>
    %366 = vector.extract_strided_slice %0 {offsets = [17, 0], sizes = [1, 32], strides = [1, 1]} : vector<24x128xf32> to vector<1x32xf32>
    %cst_100 = arith.constant dense<0.000000e+00> : vector<16xf32>
    %367 = vector.multi_reduction <add>, %364, %cst_100 [1] : vector<16x32xf32> to vector<16xf32>
    %368 = vector.shape_cast %367 : vector<16xf32> to vector<16x1xf32>
    %cst_101 = arith.constant 3.200000e+01 : f32
    %369 = vector.broadcast %cst_101 : f32 to vector<16x1xf32>
    %370 = arith.divf %368, %369 : vector<16x1xf32>
    %371 = vector.broadcast %370 : vector<16x1xf32> to vector<16x32xf32>
    %372 = arith.subf %364, %371 : vector<16x32xf32>
    %373 = arith.mulf %372, %372 : vector<16x32xf32>
    %cst_102 = arith.constant dense<0.000000e+00> : vector<16xf32>
    %374 = vector.multi_reduction <add>, %373, %cst_102 [1] : vector<16x32xf32> to vector<16xf32>
    %375 = vector.shape_cast %374 : vector<16xf32> to vector<16x1xf32>
    %cst_103 = arith.constant 3.200000e+01 : f32
    %376 = vector.broadcast %cst_103 : f32 to vector<16x1xf32>
    %377 = arith.divf %375, %376 : vector<16x1xf32>
    %378 = vector.broadcast %370 : vector<16x1xf32> to vector<16x32xf32>
    %379 = arith.subf %364, %378 : vector<16x32xf32>
    %cst_104 = arith.constant 9.99999996E-13 : f32
    %380 = vector.broadcast %cst_104 : f32 to vector<16x1xf32>
    %381 = arith.addf %377, %380 : vector<16x1xf32>
    %382 = math.rsqrt %381 : vector<16x1xf32>
    %383 = vector.broadcast %382 : vector<16x1xf32> to vector<16x32xf32>
    %384 = arith.mulf %379, %383 : vector<16x32xf32>
    %385 = vector.broadcast %365 : vector<1x32xf32> to vector<16x32xf32>
    %386 = arith.mulf %384, %385 : vector<16x32xf32>
    %387 = vector.broadcast %366 : vector<1x32xf32> to vector<16x32xf32>
    %388 = arith.addf %386, %387 : vector<16x32xf32>
    %389 = vector.shape_cast %388 : vector<16x32xf32> to vector<2x8x32xf32>
    %390 = vector.extract_strided_slice %389 {offsets = [0, 0, 0], sizes = [2, 1, 32], strides = [1, 1, 1]} : vector<2x8x32xf32> to vector<2x1x32xf32>
    %391 = vector.shape_cast %390 : vector<2x1x32xf32> to vector<2x32xf32>
    %392 = arith.truncf %391 : vector<2x32xf32> to vector<2x32xbf16>
    %c0_105 = arith.constant 0 : index
    %c0_106 = arith.constant 0 : index
    %393 = vector.load %arg8[%c0_105, %c0_106] : memref<32x32xbf16, #tpu.memory_space<vmem>>, vector<32x32xbf16>
    %cst_107 = arith.constant dense<0.000000e+00> : vector<2x32xf32>
    %394 = tpu.matmul %392, %393, %cst_107 {dimension_numbers = #tpu.dot_dimension_numbers<[1], [0], [0], [1], [0, 0, 1, 1], [], []>} : vector<2x32xbf16>, vector<32x32xbf16>, vector<2x32xf32> -> vector<2x32xf32>
    %395 = vector.extract_strided_slice %0 {offsets = [18, 0], sizes = [1, 32], strides = [1, 1]} : vector<24x128xf32> to vector<1x32xf32>
    %396 = vector.broadcast %395 : vector<1x32xf32> to vector<2x32xf32>
    %397 = arith.addf %394, %396 : vector<2x32xf32>
    %398 = math.tanh %397 : vector<2x32xf32>
    %399 = vector.extract_strided_slice %0 {offsets = [19, 0], sizes = [1, 32], strides = [1, 1]} : vector<24x128xf32> to vector<1x32xf32>
    %400 = vector.broadcast %399 : vector<1x32xf32> to vector<2x32xf32>
    %401 = arith.mulf %398, %400 : vector<2x32xf32>
    %cst_108 = arith.constant dense<0.000000e+00> : vector<2xf32>
    %402 = vector.multi_reduction <add>, %401, %cst_108 [1] : vector<2x32xf32> to vector<2xf32>
    %403 = vector.shape_cast %402 : vector<2xf32> to vector<2x1xf32>
    %404 = vector.extract_strided_slice %0 {offsets = [20, 0], sizes = [1, 1], strides = [1, 1]} : vector<24x128xf32> to vector<1x1xf32>
    %405 = vector.broadcast %404 : vector<1x1xf32> to vector<2x1xf32>
    %406 = arith.addf %403, %405 : vector<2x1xf32>
    %407 = arith.negf %406 : vector<2x1xf32>
    %408 = math.exp %407 : vector<2x1xf32>
    %cst_109 = arith.constant 1.000000e+00 : f32
    %409 = vector.broadcast %cst_109 : f32 to vector<2x1xf32>
    %410 = arith.addf %409, %408 : vector<2x1xf32>
    %411 = arith.divf %409, %410 : vector<2x1xf32>
    %cst_110 = arith.constant 4.000000e+00 : f32
    %412 = vector.broadcast %cst_110 : f32 to vector<2x1xf32>
    %413 = arith.mulf %411, %412 : vector<2x1xf32>
    %cst_111 = arith.constant 1.000000e+00 : f32
    %414 = vector.broadcast %cst_111 : f32 to vector<2x1xf32>
    %415 = arith.addf %413, %414 : vector<2x1xf32>
    %c0_112 = arith.constant 0 : index
    %c0_113 = arith.constant 0 : index
    %416 = vector.load %arg9[%c0_112, %c0_113] : memref<2x1xf32, #tpu.memory_space<vmem>>, vector<2x1xf32>
    tpu.vector_store %arg9[%c0_112, %c0_113], %415 {strides = array<i32>} : memref<2x1xf32, #tpu.memory_space<vmem>>, vector<2x1xf32>,
    return
  }
  func.func @transform_0(%arg0: i32) -> (i32, i32) {
    %c0_i32 = arith.constant 0 : i32
    %c0_i32_0 = arith.constant 0 : i32
    %c0_i32_1 = arith.constant 0 : i32
    return %c0_i32, %c0_i32_0 : i32, i32
  }
  func.func @transform_1(%arg0: i32) -> (i32, i32) {
    %c0_i32 = arith.constant 0 : i32
    %c0_i32_0 = arith.constant 0 : i32
    %c0_i32_1 = arith.constant 0 : i32
    return %c0_i32, %c0_i32_0 : i32, i32
  }
  func.func @transform_2(%arg0: i32) -> (i32, i32) {
    %c0_i32 = arith.constant 0 : i32
    %c0_i32_0 = arith.constant 0 : i32
    %c0_i32_1 = arith.constant 0 : i32
    return %c0_i32, %c0_i32_0 : i32, i32
  }
  func.func @transform_3(%arg0: i32) -> (i32, i32, i32) {
    %c0_i32 = arith.constant 0 : i32
    %c0_i32_0 = arith.constant 0 : i32
    %c0_i32_1 = arith.constant 0 : i32
    %c0_i32_2 = arith.constant 0 : i32
    return %c0_i32, %c0_i32_0, %c0_i32_1 : i32, i32, i32
  }
  func.func @transform_4(%arg0: i32) -> (i32, i32, i32) {
    %c0_i32 = arith.constant 0 : i32
    %c0_i32_0 = arith.constant 0 : i32
    %c0_i32_1 = arith.constant 0 : i32
    %c0_i32_2 = arith.constant 0 : i32
    return %c0_i32, %c0_i32_0, %c0_i32_1 : i32, i32, i32
  }
  func.func @transform_5(%arg0: i32) -> (i32, i32, i32) {
    %c0_i32 = arith.constant 0 : i32
    %c0_i32_0 = arith.constant 0 : i32
    %c0_i32_1 = arith.constant 0 : i32
    %c0_i32_2 = arith.constant 0 : i32
    return %c0_i32, %c0_i32_0, %c0_i32_1 : i32, i32, i32
  }
  func.func @transform_6(%arg0: i32) -> (i32, i32, i32) {
    %c0_i32 = arith.constant 0 : i32
    %c0_i32_0 = arith.constant 0 : i32
    %c0_i32_1 = arith.constant 0 : i32
    %c0_i32_2 = arith.constant 0 : i32
    return %c0_i32, %c0_i32_0, %c0_i32_1 : i32, i32, i32
  }
  func.func @transform_7(%arg0: i32) -> (i32, i32) {
    %c0_i32 = arith.constant 0 : i32
    %c0_i32_0 = arith.constant 0 : i32
    %c0_i32_1 = arith.constant 0 : i32
    return %c0_i32, %c0_i32_0 : i32, i32
  }
  func.func @transform_8(%arg0: i32) -> (i32, i32) {
    %c0_i32 = arith.constant 0 : i32
    %c0_i32_0 = arith.constant 0 : i32
    %c0_i32_1 = arith.constant 0 : i32
    return %c0_i32, %c0_i32_0 : i32, i32
  }
}

</mosaic_0001>

<bundles_post_ra>
// kernel: mood_bert_forward.1
= control target key start
LH: loop header
LB: loop body
LE: loop exit
PB: predicated region body
PF: predicated region fallthrough
CT: control target
= control target key end

     0   :  { %vm63_vm0 = vcmask 261120   ;;  %v2567_v14 = vmov 0.0   ;;  %vm2568_vm1 = vmmov 0   ;;  %v33_v23 = vlaneseq  ;;  %s2569_s14 = smov 88   ;;  %s2570_s15 = smov 96   ;;  %s3114_s0 = inlined_call_operand.vmem [shape: f32[16,32], index: 0, kind: input, shape index: {}]   ;;  %s3115_s3 = inlined_call_operand.vmem [shape: bf16[2,32,96], index: 3, kind: input, shape index: {}]   ;;  %s3116_s2 = inlined_call_operand.vmem [shape: f32[24,128], index: 2, kind: input, shape index: {}]   ;;  %s3117_s1 = inlined_call_operand.vmem [shape: f32[1,16], index: 1, kind: input, shape index: {}]   ;;  %s3118_s4 = inlined_call_operand.vmem [shape: bf16[2,32,32], index: 4, kind: input, shape index: {}]   ;;  %s3119_s5 = inlined_call_operand.vmem [shape: bf16[2,32,128], index: 5, kind: input, shape index: {}]   ;;  %s3120_s6 = inlined_call_operand.vmem [shape: bf16[2,128,32], index: 6, kind: input, shape index: {}]   ;;  %s3121_s7 = inlined_call_operand.vmem [shape: bf16[32,32], index: 7, kind: input, shape index: {}]   ;;  %s3122_s8 = inlined_call_operand.vmem [shape: f32[2,1], index: 8, kind: output, shape index: {}]  }
   0x1   :  { %v61_v0 = vld [vmem:[%s3114_s0] sm:$0xff]  ;;  %v62_v1 = vld [vmem:[%s3114_s0 + $0x8] sm:$0xff]  ;;  %2199 = vmatprep.subr.bf16.mxu1 %v2567_v14  ;;  %2203 = vmatprep.mubr.msk.bf16.mxu1 %vm2568_vm1, %v2567_v14  ;;  %s2571_s16 = smov 120   ;;  %s2572_s17 = smov 112   ;;  %vm172_vm2 = vcmask 64512   ;;  %vm220_vm9 = vcmask 130048  }
   0x2   :  { %v64_v2 = vsel %vm63_vm0, %v61_v0, 0.0  ;;  %v67_v3 = vsel %vm63_vm0, %v62_v1, 0.0  ;;  %v2439_v15 = vld [vmem:[%s3115_s3 + $0x8] sm:$0xff]   ;;  %2213 = vmatprep.subr.bf16.mxu0 %v2567_v14  ;;  %2215 = vmatprep.mubr.msk.bf16.mxu0 %vm2568_vm1, %v2567_v14  ;;  %v2440_v16 = vld [vmem:[%s3115_s3] sm:$0xff]   ;;  %v2655_v24 = vshrl.u32 %v33_v23, 7  ;;  %s2573_s18 = smov 80  }
   0x3   :  { %65 = vadd.xlane.f32.xlu0 %v64_v2  ;;  %2200 = vmatpush3.bf16.msra.mxu1 %v2439_v15  ;;  %v2663_v26 = vld [vmem:[%s3116_s2] sm:$0xff]  ;;  %s2574_s19 = smov 104   ;;  %s2575_s20 = smov 72   ;;  %v39_v59 = vand.u32 127, %v33_v23  ;;  %vm682_vm10 = vcmask 195584   ;;  %vm1959_vm11 = vcmask 1041409  }
   0x4   :  { %2201 = vmatprep.subr.bf16.mxu1 %v2567_v14  ;;  %v2658_v25 = vsub.s32 0, %v2655_v24  ;;  %v2668_v30 = vsub.s32 1, %v2655_v24  ;;  %v2682_v39 = vsub.s32 2, %v2655_v24  ;;  %v49_v60 = vld [vmem:[%s3117_s1] sm:$0x1]  ;;  %v36_v61 = vcvt.s32.f32 %v2655_v24  ;;  %s2578_s1 = smov 64  }
   0x5   :  { %v40_v62 = vcvt.s32.f32 %v39_v59  ;;  %v35_v63 = vadd.s32 8, %v2655_v24  ;;  %vm50_vm3 = vcmp.gt.f32.partialorder %v49_v60, 0.5  ;;  %s2579_s23 = smov 48   ;;  %s2580_s24 = smov 40   ;;  %vm2023_vm12 = vcmask 254976  }
   0x6   :  { %v94_v29 = vrot.slane %v2663_v26, %v2658_v25  ;;  %v100_v34 = vrot.slane %v2663_v26, %v2668_v30  ;;  %v111_v41 = vrot.slane %v2663_v26, %v2682_v39  ;;  %s2581_s25 = smov 56   ;;  %s2582_s28 = smov 8   ;;  %vm2040_vm13 = vcmask 1024  }
   0x7   :  { %68 = vadd.xlane.f32.xlu0 %v67_v3  ;;  %2202 = vmatpush3.bf16.msra.mxu1 %v2440_v16  ;;  %v37_v2 = vcvt.s32.f32 %v35_v63  ;;  %v2576_v3 = vmov 0   ;;  %s2583_s0 = smov 16   ;;  %s2584_s9 = smov 24  }
   0x8   :  { %2207 = vmatprep.subr.bf16.mxu1 %v2567_v14 }
  0x8c   :  { %v66_v4 = vpop.xlane.xlu0 %65 }
  0x8d   :  { %v71_v5 = vmul.f32 0.03125, %v66_v4  ;;  %v51_v4 = vsel %vm50_vm3, 1, %v2576_v3 }
  0x8f   :  { %v73_v6 = vsub.f32 %v61_v0, %v71_v5  ;;  %v41_v0 = vmul.f32 0.125, %v36_v61 }
  0x90   :  { %v69_v7 = vpop.xlane.xlu0 %68 }
  0x91   :  { %v72_v8 = vmul.f32 0.03125, %v69_v7  ;;  %v75_v9 = vmul.f32 %v73_v6, %v73_v6  ;;  %v43_v5 = vfloor.f32 %v41_v0  ;;  %v55_v7 = vrot.slane %v51_v4, %v2658_v25 }
  0x93   :  { %v74_v10 = vsub.f32 %v62_v1, %v72_v8  ;;  %v77_v11 = vsel %vm63_vm0, %v75_v9, 0.0  ;;  %v45_v1 = vmul.f32 0.125, %v40_v62  ;;  %v42_v8 = vmul.f32 0.125, %v37_v2 }
  0x94   :  { %78 = vadd.xlane.f32.xlu1 %v77_v11  ;;  %vm56_vm5 = vcmp.eq.s32.totalorder %v55_v7, 1 }
  0x95   :  { %v76_v12 = vmul.f32 %v74_v10, %v74_v10  ;;  %v44_v9 = vfloor.f32 %v42_v8 }
  0x97   :  { %v80_v13 = vsel %vm63_vm0, %v76_v12, 0.0 }
  0x98   :  { %81 = vadd.xlane.f32.xlu1 %v80_v13 }
 0x11d   :  { %v79_v17 = vpop.xlane.xlu1 %78 }
 0x11e   :  { %v83_v18 = vmul.f32 0.03125, %v79_v17 }
 0x120   :  { %v85_v19 = vadd.f32 1e-12, %v83_v18 }
 0x121   :  { %v82_v20 = vpop.xlane.xlu1 %81 }
 0x122   :  { %2469 = vrsqrt.f32 %v85_v19  ;;  %v84_v21 = vmul.f32 0.03125, %v82_v20 }
 0x124   :  { %v86_v22 = vadd.f32 1e-12, %v84_v21 }
 0x126   :  { %2471 = vrsqrt.f32 %v86_v22 }
 0x12f   :  { %v2470_v27 = vpop.eup %2469 }
 0x130   :  { %v89_v28 = vmul.f32 %v2470_v27, %v73_v6  ;;  %v46_v6 = vfloor.f32 %v45_v1 }
 0x132   :  { %v95_v33 = vmul.f32 %v94_v29, %v89_v28  ;;  %vm47_vm4 = vcmp.eq.f32.partialorder %v43_v5, %v46_v6  ;;  %vm48_vm7 = vcmp.eq.f32.partialorder %v44_v9, %v46_v6 }
 0x133   :  { %v2472_v31 = vpop.eup %2471  ;;  %vm57_vm6 = vmand %vm47_vm4, %vm56_vm5 }
 0x134   :  { %v90_v32 = vmul.f32 %v2472_v31, %v74_v10  ;;  %v2672_v36 = vadd.f32 %v100_v34, %v95_v33  ;;  %v2577_v10 = vmov -1e+09   ;;  %vm58_vm8 = vmand %vm48_vm7, %vm56_vm5 }
 0x135   :  { %v2730_v11 = vsel %vm57_vm6, 0.0, %v2577_v10  ;;  %v2733_v16 = vsel %vm58_vm8, 0.0, %v2577_v10 }
 0x136   :  { %v96_v35 = vmul.f32 %v94_v29, %v90_v32 }
 0x138   :  { %v2674_v37 = vadd.f32 %v100_v34, %v96_v35 }
 0x13a   :  { %v103_v38 = vpack.c.bf16 %v2674_v37, %v2672_v36 }
 0x13c   :  { %2204 = vmatmul.mubr.msk.bf16.vlgmr.msra.gmra.mxu1 %vm63_vm0, %v103_v38 }
 0x13d   :  { %2209 = vmatprep.mubr.msk.bf16.mxu1 %vm2568_vm1, %v2567_v14 }
 0x1fc   :  { %v161_v40 = vpop.f32.mrf.mxu1 }
 0x1fd   :  { %v162_v44 = vadd.f32 %v161_v40, %v111_v41 }
 0x1fe   :  { %v2205_v42 = vpop.f32.mrf.mxu1 }
 0x200   :  { %v164_v43 = vpop.f32.mrf.mxu1 }
 0x201   :  { %v165_v45 = vadd.f32 %v164_v43, %v111_v41 }
 0x202   :  { %v2206_v46 = vpop.f32.mrf.mxu1 }
 0x203   :  { %v2686_v47 = vpack.c.bf16 %v165_v45, %v162_v44 }
 0x205   :  { %293 = vrot.lane.b32.xlu1 %v2686_v47, %s2569_s14  ;;  %170 = vrot.lane.b32.xlu0 %v2686_v47, %s2570_s15 }
 0x209   :  { %291 = vrot.lane.b32.xlu1 %v2686_v47, %s2571_s16  ;;  %412 = vrot.lane.b32.xlu0 %v2686_v47, %s2572_s17 }
 0x20d   :  { %414 = vrot.lane.b32.xlu1 %v2686_v47, %s2573_s18  ;;  %533 = vrot.lane.b32.xlu0 %v2686_v47, %s2574_s19 }
 0x211   :  { %535 = vrot.lane.b32.xlu1 %v2686_v47, %s2575_s20 }
 0x277   :  { %v171_v48 = vpop.permute.xlu0 %170  ;;  %v294_v50 = vpop.permute.xlu1 %293 }
 0x278   :  { %v177_v49 = vsel %vm172_vm2, %v171_v48, 0  ;;  %v299_v52 = vsel %vm172_vm2, %v294_v50, 0 }
 0x279   :  { %2208 = vmatpush3.bf16.xpose.msra.mxu1 %v177_v49 }
 0x27a   :  { %2219 = vmatprep.subr.bf16.mxu1 %v2567_v14 }
 0x27b   :  { %v292_v51 = vpop.permute.xlu1 %291  ;;  %v413_v56 = vpop.permute.xlu0 %412 }
 0x27f   :  { %v415_v53 = vpop.permute.xlu1 %414  ;;  %v534_v58 = vpop.permute.xlu0 %533 }
 0x280   :  { %2210 = vmatmul.mubr.msk.bf16.vlgmr.msra.gmra.mxu1 %vm172_vm2, %v2686_v47  ;;  %v420_v54 = vsel %vm172_vm2, %v415_v53, 0 }
 0x281   :  { %2220 = vmatpush3.bf16.xpose.msra.mxu1 %v299_v52  ;;  %2221 = vmatprep.mubr.msk.bf16.mxu1 %vm2568_vm1, %v2567_v14 }
 0x282   :  { %2231 = vmatprep.subr.bf16.mxu1 %v2567_v14 }
 0x283   :  { %v536_v55 = vpop.permute.xlu1 %535 }
 0x284   :  { %v541_v57 = vsel %vm172_vm2, %v536_v55, 0 }
 0x288   :  { %2222 = vmatmul.mubr.msk.bf16.vlgmr.msra.gmra.mxu1 %vm172_vm2, %v292_v51 }
 0x289   :  { %2232 = vmatpush3.bf16.xpose.msra.mxu1 %v420_v54  ;;  %2233 = vmatprep.mubr.msk.bf16.mxu1 %vm2568_vm1, %v2567_v14 }
 0x28a   :  { %2243 = vmatprep.subr.bf16.mxu1 %v2567_v14 }
 0x290   :  { %2234 = vmatmul.mubr.msk.bf16.vlgmr.msra.gmra.mxu1 %vm172_vm2, %v413_v56 }
 0x291   :  { %2244 = vmatpush3.bf16.xpose.msra.mxu1 %v541_v57  ;;  %2245 = vmatprep.mubr.msk.bf16.mxu1 %vm2568_vm1, %v2567_v14 }
 0x292   :  { %2255 = vmatprep.subr.bf16.mxu1 %v2567_v14 }
 0x298   :  { %2246 = vmatmul.mubr.msk.bf16.vlgmr.msra.gmra.mxu1 %vm172_vm2, %v534_v58 }
 0x299   :  { %2259 = vmatprep.mubr.msk.bf16.mxu1 %vm2568_vm1, %v2567_v14 }
 0x340   :  { %v213_v12 = vpop.f32.mrf.mxu1 }
 0x341   :  { %v214_v13 = vadd.f32 %v213_v12, %v2730_v11 }
 0x342   :  { %v2211_v15 = vpop.f32.mrf.mxu1 }
 0x343   :  { %v221_v17 = vsel %vm220_vm9, %v214_v13, -inf }
 0x344   :  { %222 = vmax.xlane.f32.xlu1 %v221_v17  ;;  %v216_v18 = vpop.f32.mrf.mxu1 }
 0x345   :  { %v217_v19 = vadd.f32 %v216_v18, %v2733_v16 }
 0x346   :  { %v2212_v20 = vpop.f32.mrf.mxu1 }
 0x347   :  { %v224_v21 = vsel %vm220_vm9, %v217_v19, -inf }
 0x348   :  { %225 = vmax.xlane.f32.xlu0 %v224_v21  ;;  %v335_v22 = vpop.f32.mrf.mxu1 }
 0x349   :  { %v336_v23 = vadd.f32 %v335_v22, %v2730_v11 }
 0x34a   :  { %v2223_v27 = vpop.f32.mrf.mxu1 }
 0x34b   :  { %v342_v28 = vsel %vm220_vm9, %v336_v23, -inf }
 0x34c   :  { %343 = vmax.xlane.f32.xlu0 %v342_v28  ;;  %v338_v29 = vpop.f32.mrf.mxu1 }
 0x34d   :  { %v339_v31 = vadd.f32 %v338_v29, %v2733_v16 }
 0x34e   :  { %v2224_v32 = vpop.f32.mrf.mxu1 }
 0x34f   :  { %v345_v33 = vsel %vm220_vm9, %v339_v31, -inf }
 0x350   :  { %346 = vmax.xlane.f32.xlu0 %v345_v33  ;;  %v456_v34 = vpop.f32.mrf.mxu1 }
 0x351   :  { %v457_v35 = vadd.f32 %v456_v34, %v2730_v11 }
 0x352   :  { %v2235_v38 = vpop.f32.mrf.mxu1 }
 0x353   :  { %v463_v40 = vsel %vm220_vm9, %v457_v35, -inf }
 0x354   :  { %464 = vmax.xlane.f32.xlu1 %v463_v40  ;;  %v459_v41 = vpop.f32.mrf.mxu1 }
 0x355   :  { %v460_v42 = vadd.f32 %v459_v41, %v2733_v16 }
 0x356   :  { %v2236_v43 = vpop.f32.mrf.mxu1 }
 0x357   :  { %v466_v44 = vsel %vm220_vm9, %v460_v42, -inf }
 0x358   :  { %467 = vmax.xlane.f32.xlu0 %v466_v44  ;;  %v577_v45 = vpop.f32.mrf.mxu1 }
 0x359   :  { %v578_v46 = vadd.f32 %v577_v45, %v2730_v11 }
 0x35a   :  { %v2247_v48 = vpop.f32.mrf.mxu1 }
 0x35b   :  { %v584_v49 = vsel %vm220_vm9, %v578_v46, -inf }
 0x35c   :  { %585 = vmax.xlane.f32.xlu1 %v584_v49  ;;  %v580_v50 = vpop.f32.mrf.mxu1 }
 0x35d   :  { %v581_v51 = vadd.f32 %v580_v50, %v2733_v16 }
 0x35e   :  { %v2248_v52 = vpop.f32.mrf.mxu1 }
 0x35f   :  { %v587_v53 = vsel %vm220_vm9, %v581_v51, -inf }
 0x360   :  { %588 = vmax.xlane.f32.xlu0 %v587_v53 }
 0x36d   :  { %244 = vrot.lane.b32.xlu1 %v2686_v47, %s2578_s1 }
 0x3cd   :  { %v223_v54 = vpop.xlane.xlu1 %222 }
 0x3ce   :  { %v227_v55 = vsub.f32 %v214_v13, %v223_v54 }
 0x3d0   :  { %v229_v56 = vmul.f32 1.442695, %v227_v55 }
 0x3d1   :  { %v226_v57 = vpop.xlane.xlu0 %225 }
 0x3d2   :  { %2473 = vpow2.f32 %v229_v56  ;;  %v228_v58 = vsub.f32 %v217_v19, %v226_v57 }
 0x3d4   :  { %v231_v59 = vmul.f32 1.442695, %v228_v58 }
 0x3d5   :  { %v344_v60 = vpop.xlane.xlu0 %343 }
 0x3d6   :  { %2475 = vpow2.f32 %v231_v59  ;;  %v348_v61 = vsub.f32 %v336_v23, %v344_v60 }
 0x3d8   :  { %v350_v62 = vmul.f32 1.442695, %v348_v61 }
 0x3d9   :  { %v347_v63 = vpop.xlane.xlu0 %346 }
 0x3da   :  { %2477 = vpow2.f32 %v350_v62  ;;  %v349_v0 = vsub.f32 %v339_v31, %v347_v63 }
 0x3dc   :  { %v352_v1 = vmul.f32 1.442695, %v349_v0 }
 0x3dd   :  { %v465_v2 = vpop.xlane.xlu1 %464 }
 0x3de   :  { %2479 = vpow2.f32 %v352_v1  ;;  %v469_v3 = vsub.f32 %v457_v35, %v465_v2 }
 0x3df   :  { %v2474_v4 = vpop.eup %2473 }
 0x3e0   :  { %v471_v5 = vmul.f32 1.442695, %v469_v3  ;;  %v233_v6 = vsel %vm220_vm9, %v2474_v4, 0.0 }
 0x3e1   :  { %v468_v7 = vpop.xlane.xlu0 %467  ;;  %234 = vadd.xlane.f32.xlu1 %v233_v6 }
 0x3e2   :  { %2481 = vpow2.f32 %v471_v5  ;;  %v470_v8 = vsub.f32 %v460_v42, %v468_v7 }
 0x3e3   :  { %v2476_v9 = vpop.eup %2475 }
 0x3e4   :  { %v473_v10 = vmul.f32 1.442695, %v470_v8  ;;  %v236_v12 = vsel %vm220_vm9, %v2476_v9, 0.0 }
 0x3e5   :  { %v586_v13 = vpop.xlane.xlu1 %585  ;;  %237 = vadd.xlane.f32.xlu0 %v236_v12 }
 0x3e6   :  { %2483 = vpow2.f32 %v473_v10  ;;  %v590_v15 = vsub.f32 %v578_v46, %v586_v13 }
 0x3e7   :  { %v2478_v17 = vpop.eup %2477 }
 0x3e8   :  { %v592_v18 = vmul.f32 1.442695, %v590_v15  ;;  %v354_v19 = vsel %vm220_vm9, %v2478_v17, 0.0 }
 0x3e9   :  { %355 = vadd.xlane.f32.xlu1 %v354_v19  ;;  %v245_v20 = vpop.permute.xlu1 %244  ;;  %v589_v21 = vpop.xlane.xlu0 %588  ;;  %v2441_v19 = vld [vmem:[%s3118_s4 + $0x8] sm:$0xff]  }
 0x3ea   :  { %2485 = vpow2.f32 %v592_v18  ;;  %v591_v22 = vsub.f32 %v581_v51, %v589_v21  ;;  %2214 = vmatpush3.bf16.msra.mxu0 %v245_v20  ;;  %2256 = vmatpush3.bf16.msra.mxu1 %v2441_v19 }
 0x3eb   :  { %v2480_v23 = vpop.eup %2479  ;;  %2225 = vmatprep.subr.bf16.mxu0 %v2567_v14  ;;  %2257 = vmatprep.subr.bf16.mxu1 %v2567_v14 }
 0x3ec   :  { %v594_v27 = vmul.f32 1.442695, %v591_v22  ;;  %v357_v28 = vsel %vm220_vm9, %v2480_v23, 0.0 }
 0x3ed   :  { %358 = vadd.xlane.f32.xlu0 %v357_v28 }
 0x3ee   :  { %2487 = vpow2.f32 %v594_v27 }
 0x3ef   :  { %v2482_v29 = vpop.eup %2481 }
 0x3f0   :  { %v475_v31 = vsel %vm220_vm9, %v2482_v29, 0.0 }
 0x3f1   :  { %476 = vadd.xlane.f32.xlu1 %v475_v31 }
 0x3f3   :  { %v2484_v32 = vpop.eup %2483 }
 0x3f4   :  { %v478_v33 = vsel %vm220_vm9, %v2484_v32, 0.0 }
 0x3f5   :  { %479 = vadd.xlane.f32.xlu0 %v478_v33 }
 0x3f7   :  { %v2486_v34 = vpop.eup %2485 }
 0x3f8   :  { %v596_v35 = vsel %vm220_vm9, %v2486_v34, 0.0 }
 0x3f9   :  { %597 = vadd.xlane.f32.xlu1 %v596_v35 }
 0x3fb   :  { %v2488_v38 = vpop.eup %2487 }
 0x3fc   :  { %v599_v40 = vsel %vm220_vm9, %v2488_v38, 0.0 }
 0x3fd   :  { %600 = vadd.xlane.f32.xlu0 %v599_v40 }
 0x40a   :  { %486 = vrot.lane.b32.xlu1 %v2686_v47, %s2579_s23 }
 0x40e   :  { %607 = vrot.lane.b32.xlu1 %v2686_v47, %s2580_s24 }
 0x413   :  { %365 = vrot.lane.b32.xlu0 %v2686_v47, %s2581_s25 }
 0x46a   :  { %v235_v41 = vpop.xlane.xlu1 %234 }
 0x46b   :  { %2489 = vrcp.f32 %v235_v41 }
 0x46e   :  { %v238_v42 = vpop.xlane.xlu0 %237 }
 0x46f   :  { %2491 = vrcp.f32 %v238_v42 }
 0x472   :  { %v356_v44 = vpop.xlane.xlu1 %355 }
 0x476   :  { %v359_v43 = vpop.xlane.xlu0 %358 }
 0x477   :  { %2493 = vrcp.f32 %v359_v43 }
 0x478   :  { %v2490_v45 = vpop.eup %2489  ;;  %2495 = vrcp.f32 %v356_v44 }
 0x479   :  { %v241_v48 = vmul.f32 %v2490_v45, %v2474_v4 }
 0x47a   :  { %v477_v51 = vpop.xlane.xlu1 %476 }
 0x47c   :  { %v2492_v46 = vpop.eup %2491 }
 0x47d   :  { %v242_v49 = vmul.f32 %v2492_v46, %v2476_v9 }
 0x47e   :  { %v480_v50 = vpop.xlane.xlu0 %479 }
 0x47f   :  { %v243_v52 = vpack.c.bf16 %v242_v49, %v241_v48  ;;  %2497 = vrcp.f32 %v480_v50 }
 0x480   :  { %2499 = vrcp.f32 %v477_v51 }
 0x481   :  { %2216 = vmatmul.mubr.msk.bf16.vlgmr.msra.gmra.mxu0 %vm220_vm9, %v243_v52 }
 0x482   :  { %2227 = vmatprep.mubr.msk.bf16.mxu0 %vm2568_vm1, %v2567_v14  ;;  %v598_v55 = vpop.xlane.xlu1 %597 }
 0x484   :  { %v2494_v47 = vpop.eup %2493 }
 0x485   :  { %v2496_v54 = vpop.eup %2495  ;;  %v363_v56 = vmul.f32 %v2494_v47, %v2480_v23  ;;  %v2442_v23 = vld [vmem:[%s3118_s4] sm:$0xff]  }
 0x486   :  { %v601_v53 = vpop.xlane.xlu0 %600  ;;  %v362_v58 = vmul.f32 %v2496_v54, %v2478_v17  ;;  %v487_v61 = vpop.permute.xlu1 %486  ;;  %2258 = vmatpush3.bf16.msra.mxu1 %v2442_v23 }
 0x487   :  { %2501 = vrcp.f32 %v601_v53  ;;  %2271 = vmatprep.subr.bf16.mxu1 %v2567_v14 }
 0x488   :  { %2503 = vrcp.f32 %v598_v55  ;;  %v364_v59 = vpack.c.bf16 %v363_v56, %v362_v58  ;;  %v2803_v55 = vsub.s32 3, %v2655_v24 }
 0x48a   :  { %v366_v57 = vpop.permute.xlu0 %365  ;;  %v608_v3 = vpop.permute.xlu1 %607  ;;  %v693_v56 = vrot.slane %v2663_v26, %v2803_v55 }
 0x48b   :  { %2226 = vmatpush3.bf16.msra.mxu0 %v366_v57 }
 0x48c   :  { %2237 = vmatprep.subr.bf16.mxu0 %v2567_v14  ;;  %v2498_v60 = vpop.eup %2497 }
 0x48d   :  { %v2500_v62 = vpop.eup %2499  ;;  %v484_v63 = vmul.f32 %v2498_v60, %v2484_v32 }
 0x48e   :  { %2228 = vmatmul.mubr.msk.bf16.vlgmr.msra.gmra.mxu0 %vm220_vm9, %v364_v59  ;;  %v483_v0 = vmul.f32 %v2500_v62, %v2482_v29 }
 0x48f   :  { %2238 = vmatpush3.bf16.msra.mxu0 %v487_v61  ;;  %2239 = vmatprep.mubr.msk.bf16.mxu0 %vm2568_vm1, %v2567_v14 }
 0x490   :  { %2249 = vmatprep.subr.bf16.mxu0 %v2567_v14  ;;  %v485_v1 = vpack.c.bf16 %v484_v63, %v483_v0 }
 0x494   :  { %v2502_v2 = vpop.eup %2501 }
 0x495   :  { %v2504_v4 = vpop.eup %2503  ;;  %v605_v5 = vmul.f32 %v2502_v2, %v2488_v38 }
 0x496   :  { %2240 = vmatmul.mubr.msk.bf16.vlgmr.msra.gmra.mxu0 %vm220_vm9, %v485_v1  ;;  %v604_v6 = vmul.f32 %v2504_v4, %v2486_v34 }
 0x497   :  { %2250 = vmatpush3.bf16.msra.mxu0 %v608_v3  ;;  %2251 = vmatprep.mubr.msk.bf16.mxu0 %vm2568_vm1, %v2567_v14 }
 0x498   :  { %2263 = vmatprep.subr.bf16.mxu0 %v2567_v14  ;;  %v606_v7 = vpack.c.bf16 %v605_v5, %v604_v6 }
 0x49e   :  { %2252 = vmatmul.mubr.msk.bf16.vlgmr.msra.gmra.mxu0 %vm220_vm9, %v606_v7 }
 0x49f   :  { %2267 = vmatprep.mubr.msk.bf16.mxu0 %vm2568_vm1, %v2567_v14 }
 0x541   :  { %v284_v8 = vpop.f32.mrf.mxu0 }
 0x543   :  { %v2217_v9 = vpop.f32.mrf.mxu0 }
 0x545   :  { %v287_v10 = vpop.f32.mrf.mxu0 }
 0x547   :  { %v2218_v12 = vpop.f32.mrf.mxu0 }
 0x54e   :  { %v405_v13 = vpop.f32.mrf.mxu0 }
 0x550   :  { %v2229_v15 = vpop.f32.mrf.mxu0 }
 0x552   :  { %v408_v17 = vpop.f32.mrf.mxu0 }
 0x553   :  { %v2409_v18 = vpack.i.bf16 %v408_v17, %v405_v13  ;;  %v2444_v13 = vld [vmem:[%s3119_s5] sm:$0xff]  }
 0x554   :  { %v2230_v20 = vpop.f32.mrf.mxu0 }
 0x555   :  { %2410 = vrot.lane.b32.xlu1 %v2409_v18, %s2582_s28 }
 0x556   :  { %v526_v21 = vpop.f32.mrf.mxu0 }
 0x558   :  { %v2241_v22 = vpop.f32.mrf.mxu0 }
 0x559   :  { %v2822_v22 = vsub.s32 4, %v2655_v24 }
 0x55a   :  { %v529_v27 = vpop.f32.mrf.mxu0 }
 0x55b   :  { %v2414_v28 = vpack.i.bf16 %v529_v27, %v526_v21 }
 0x55c   :  { %v2242_v29 = vpop.f32.mrf.mxu0 }
 0x55d   :  { %2415 = vrot.lane.b32.xlu0 %v2414_v28, %s2583_s0  ;;  %v781_v28 = vrot.slane %v2663_v26, %v2822_v22  ;;  %v786_v29 = vsub.s32 5, %v2655_v24 }
 0x55e   :  { %v647_v31 = vpop.f32.mrf.mxu0 }
 0x560   :  { %v2253_v32 = vpop.f32.mrf.mxu0 }
 0x562   :  { %v650_v33 = vpop.f32.mrf.mxu0 }
 0x563   :  { %v2419_v34 = vpack.i.bf16 %v650_v33, %v647_v31 }
 0x564   :  { %v2254_v35 = vpop.f32.mrf.mxu0 }
 0x565   :  { %2420 = vrot.lane.b32.xlu1 %v2419_v34, %s2584_s9  ;;  %v787_v34 = vrot.slane %v2663_v26, %v786_v29 }
 0x5c7   :  { %v2411_v38 = vpop.permute.xlu1 %2410 }
 0x5c8   :  { %v2413_v41 = vunpack.i.h.bf16 %v2411_v38  ;;  %v2412_v42 = vunpack.i.l.bf16 %v2411_v38 }
 0x5ca   :  { %v679_v46 = vsel %vm172_vm2, %v287_v10, %v2413_v41  ;;  %v678_v48 = vsel %vm172_vm2, %v284_v8, %v2412_v42  ;;  %v2445_v42 = vld [vmem:[%s3120_s6 + $0x38] sm:$0xff]  }
 0x5cf   :  { %v2416_v40 = vpop.permute.xlu0 %2415 }
 0x5d0   :  { %v2418_v43 = vunpack.i.h.bf16 %v2416_v40  ;;  %v2417_v44 = vunpack.i.l.bf16 %v2416_v40 }
 0x5d2   :  { %v681_v51 = vsel %vm220_vm9, %v679_v46, %v2418_v43  ;;  %v680_v52 = vsel %vm220_vm9, %v678_v48, %v2417_v44  ;;  %v2446_v43 = vld [vmem:[%s3120_s6 + $0x30] sm:$0xff]   ;;  %v2447_v44 = vld [vmem:[%s3120_s6 + $0x28] sm:$0xff]   ;;  %v2449_v46 = vld [vmem:[%s3120_s6 + $0x18] sm:$0xff]  }
 0x5d3   :  { %v2450_v48 = vld [vmem:[%s3120_s6 + $0x10] sm:$0xff]  }
 0x5d7   :  { %v2421_v45 = vpop.permute.xlu1 %2420 }
 0x5d8   :  { %v2423_v49 = vunpack.i.h.bf16 %v2421_v45  ;;  %v2422_v50 = vunpack.i.l.bf16 %v2421_v45  ;;  %v2448_v45 = vld [vmem:[%s3120_s6 + $0x20] sm:$0xff]  }
 0x5da   :  { %v684_v47 = vsel %vm682_vm10, %v681_v51, %v2423_v49  ;;  %v683_v53 = vsel %vm682_vm10, %v680_v52, %v2422_v50  ;;  %v2451_v49 = vld [vmem:[%s3120_s6 + $0x8] sm:$0xff]   ;;  %v2452_v50 = vld [vmem:[%s3120_s6] sm:$0xff]   ;;  %v797_v51 = vsub.s32 6, %v2655_v24 }
 0x5db   :  { %v685_v54 = vpack.c.bf16 %v684_v47, %v683_v53 }
 0x5dc   :  { %v798_v52 = vrot.slane %v2663_v26, %v797_v51 }
 0x5dd   :  { %2260 = vmatmul.mubr.msk.bf16.vlgmr.msra.gmra.mxu1 %vm63_vm0, %v685_v54 }
 0x5de   :  { %2287 = vmatprep.mubr.msk.bf16.mxu1 %vm2568_vm1, %v2567_v14  ;;  %2272 = vmatpush3.bf16.msra.mxu1 %v2445_v42 }
 0x5df   :  { %2273 = vmatprep.subr.bf16.mxu1 %v2567_v14 }
 0x5e2   :  { %2274 = vmatpush3.bf16.msra.mxu1 %v2446_v43 }
 0x5e3   :  { %2275 = vmatprep.subr.bf16.mxu1 %v2567_v14 }
 0x5e6   :  { %2276 = vmatpush3.bf16.msra.mxu1 %v2447_v44 }
 0x5e7   :  { %2277 = vmatprep.subr.bf16.mxu1 %v2567_v14 }
 0x5ea   :  { %2278 = vmatpush3.bf16.msra.mxu1 %v2448_v45 }
 0x5eb   :  { %2279 = vmatprep.subr.bf16.mxu1 %v2567_v14 }
 0x5ee   :  { %2280 = vmatpush3.bf16.msra.mxu1 %v2449_v46  ;;  %v2454_v46 = vld [vmem:[%s3115_s3 + $0x10] sm:$0xff]  }
 0x5ef   :  { %2281 = vmatprep.subr.bf16.mxu1 %v2567_v14 }
 0x5f2   :  { %2282 = vmatpush3.bf16.msra.mxu1 %v2450_v48 }
 0x5f3   :  { %2283 = vmatprep.subr.bf16.mxu1 %v2567_v14 }
 0x5f6   :  { %2284 = vmatpush3.bf16.msra.mxu1 %v2451_v49 }
 0x5f7   :  { %2285 = vmatprep.subr.bf16.mxu1 %v2567_v14 }
 0x5fa   :  { %2286 = vmatpush3.bf16.msra.mxu1 %v2452_v50 }
 0x5fb   :  { %2317 = vmatprep.subr.bf16.mxu1 %v2567_v14 }
 0x69d   :  { %v743_v57 = vpop.f32.mrf.mxu1 }
 0x69e   :  { %v744_v58 = vadd.f32 %v743_v57, %v693_v56 }
 0x69f   :  { %v2261_v59 = vpop.f32.mrf.mxu1 }
 0x6a0   :  { %v750_v60 = vadd.f32 %v744_v58, %v2672_v36 }
 0x6a1   :  { %v746_v61 = vpop.f32.mrf.mxu1 }
 0x6a2   :  { %v747_v62 = vadd.f32 %v746_v61, %v693_v56  ;;  %v752_v63 = vsel %vm63_vm0, %v750_v60, 0.0 }
 0x6a3   :  { %753 = vadd.xlane.f32.xlu0 %v752_v63  ;;  %v2262_v0 = vpop.f32.mrf.mxu1 }
 0x6a4   :  { %v751_v1 = vadd.f32 %v747_v62, %v2674_v37  ;;  %v2443_v37 = vld [vmem:[%s3119_s5 + $0x8] sm:$0xff]  }
 0x6a5   :  { %2264 = vmatpush3.bf16.msra.mxu0 %v2443_v37 }
 0x6a6   :  { %v755_v2 = vsel %vm63_vm0, %v751_v1, 0.0  ;;  %2265 = vmatprep.subr.bf16.mxu0 %v2567_v14 }
 0x6a7   :  { %756 = vadd.xlane.f32.xlu1 %v755_v2 }
 0x6a9   :  { %2266 = vmatpush3.bf16.msra.mxu0 %v2444_v13  ;;  %v892_v13 = vsub.s32 7, %v2655_v24 }
 0x6aa   :  { %2291 = vmatprep.subr.bf16.mxu0 %v2567_v14 }
 0x72c   :  { %v754_v3 = vpop.xlane.xlu0 %753 }
 0x72d   :  { %v758_v4 = vmul.f32 0.03125, %v754_v3 }
 0x72f   :  { %v760_v5 = vsub.f32 %v750_v60, %v758_v4 }
 0x730   :  { %v757_v6 = vpop.xlane.xlu1 %756 }
 0x731   :  { %v759_v7 = vmul.f32 0.03125, %v757_v6  ;;  %v762_v8 = vmul.f32 %v760_v5, %v760_v5 }
 0x733   :  { %v761_v9 = vsub.f32 %v751_v1, %v759_v7  ;;  %v764_v36 = vsel %vm63_vm0, %v762_v8, 0.0 }
 0x734   :  { %765 = vadd.xlane.f32.xlu0 %v764_v36 }
 0x735   :  { %v763_v10 = vmul.f32 %v761_v9, %v761_v9 }
 0x737   :  { %v767_v12 = vsel %vm63_vm0, %v763_v10, 0.0 }
 0x738   :  { %768 = vadd.xlane.f32.xlu0 %v767_v12 }
 0x7bd   :  { %v766_v15 = vpop.xlane.xlu0 %765 }
 0x7be   :  { %v770_v17 = vmul.f32 0.03125, %v766_v15  ;;  %v893_v15 = vrot.slane %v2663_v26, %v892_v13 }
 0x7c0   :  { %v772_v18 = vadd.f32 1e-12, %v770_v17 }
 0x7c1   :  { %v769_v19 = vpop.xlane.xlu0 %768 }
 0x7c2   :  { %2505 = vrsqrt.f32 %v772_v18  ;;  %v771_v20 = vmul.f32 0.03125, %v769_v19 }
 0x7c4   :  { %v773_v21 = vadd.f32 1e-12, %v771_v20 }
 0x7c6   :  { %2507 = vrsqrt.f32 %v773_v21 }
 0x7cf   :  { %v2506_v23 = vpop.eup %2505 }
 0x7d0   :  { %v776_v27 = vmul.f32 %v2506_v23, %v760_v5 }
 0x7d2   :  { %v782_v33 = vmul.f32 %v781_v28, %v776_v27 }
 0x7d3   :  { %v2508_v31 = vpop.eup %2507 }
 0x7d4   :  { %v777_v32 = vmul.f32 %v2508_v31, %v761_v9  ;;  %v2830_v38 = vadd.f32 %v787_v34, %v782_v33 }
 0x7d6   :  { %v783_v35 = vmul.f32 %v781_v28, %v777_v32 }
 0x7d8   :  { %v2832_v40 = vadd.f32 %v787_v34, %v783_v35 }
 0x7da   :  { %v790_v41 = vpack.c.bf16 %v2832_v40, %v2830_v38 }
 0x7dc   :  { %2268 = vmatmul.mubr.msk.bf16.vlgmr.msra.gmra.mxu0 %vm63_vm0, %v790_v41 }
 0x7dd   :  { %2295 = vmatprep.mubr.msk.bf16.mxu0 %vm2568_vm1, %v2567_v14 }
 0x89c   :  { %v848_v47 = vpop.f32.mrf.mxu0 }
 0x89d   :  { %v849_v53 = vadd.f32 %v848_v47, %v798_v52 }
 0x89e   :  { %v2269_v54 = vpop.f32.mrf.mxu0 }
 0x89f   :  { %v857_v56 = vmul.f32 0.044715, %v849_v53  ;;  %v855_v8 = vmul.f32 0.5, %v849_v53  ;;  %v2898_v54 = vld [vmem:[%s3116_s2 + $0x8] sm:$0xff] }
 0x8a0   :  { %v851_v57 = vpop.f32.mrf.mxu0 }
 0x8a1   :  { %v859_v58 = vmul.f32 %v857_v56, %v849_v53  ;;  %v852_v59 = vadd.f32 %v851_v57, %v798_v52 }
 0x8a2   :  { %v2270_v60 = vpop.f32.mrf.mxu0 }
 0x8a3   :  { %v861_v61 = vmul.f32 %v859_v58, %v849_v53  ;;  %v858_v62 = vmul.f32 0.044715, %v852_v59  ;;  %v856_v9 = vmul.f32 0.5, %v852_v59  ;;  %v1014_v58 = vrot.slane %v2898_v54, %v2658_v25 }
 0x8a5   :  { %v863_v63 = vadd.f32 %v861_v61, %v849_v53  ;;  %v860_v0 = vmul.f32 %v858_v62, %v852_v59  ;;  %v1020_v62 = vrot.slane %v2898_v54, %v2668_v30 }
 0x8a7   :  { %v865_v1 = vmul.f32 0.7978846, %v863_v63  ;;  %v862_v2 = vmul.f32 %v860_v0, %v852_v59 }
 0x8a9   :  { %2509 = vtanh.f32 %v865_v1  ;;  %v864_v3 = vadd.f32 %v862_v2, %v852_v59 }
 0x8ab   :  { %v866_v4 = vmul.f32 0.7978846, %v864_v3 }
 0x8ad   :  { %2511 = vtanh.f32 %v866_v4  ;;  %v1032_v4 = vrot.slane %v2898_v54, %v2682_v39 }
 0x8b6   :  { %v2510_v5 = vpop.eup %2509 }
 0x8b7   :  { %v869_v6 = vadd.f32 1.0, %v2510_v5 }
 0x8b9   :  { %v871_v10 = vmul.f32 %v869_v6, %v855_v8 }
 0x8ba   :  { %v2512_v7 = vpop.eup %2511 }
 0x8bb   :  { %v870_v36 = vadd.f32 1.0, %v2512_v7 }
 0x8bd   :  { %v872_v12 = vmul.f32 %v870_v36, %v856_v9 }
 0x8bf   :  { %v873_v37 = vpack.c.bf16 %v872_v12, %v871_v10 }
 0x8c1   :  { %2288 = vmatmul.mubr.bf16.vlgmr.msra.gmra.mxu1 %v873_v37 }
 0x8c2   :  { %2319 = vmatprep.mubr.msk.bf16.mxu1 %vm2568_vm1, %v2567_v14 }
 0x981   :  { %v976_v17 = vpop.f32.mrf.mxu1 }
 0x982   :  { %v977_v18 = vadd.f32 %v976_v17, %v893_v15 }
 0x983   :  { %v2289_v19 = vpop.f32.mrf.mxu1 }
 0x984   :  { %v983_v20 = vadd.f32 %v977_v18, %v2830_v38 }
 0x985   :  { %v979_v21 = vpop.f32.mrf.mxu1 }
 0x986   :  { %v980_v23 = vadd.f32 %v979_v21, %v893_v15  ;;  %v985_v27 = vsel %vm63_vm0, %v983_v20, 0.0 }
 0x987   :  { %986 = vadd.xlane.f32.xlu0 %v985_v27  ;;  %v2290_v28 = vpop.f32.mrf.mxu1 }
 0x988   :  { %v984_v31 = vadd.f32 %v980_v23, %v2832_v40  ;;  %v2453_v40 = vld [vmem:[%s3115_s3 + $0x18] sm:$0xff]  }
 0x989   :  { %2292 = vmatpush3.bf16.msra.mxu0 %v2453_v40 }
 0x98a   :  { %v988_v32 = vsel %vm63_vm0, %v984_v31, 0.0  ;;  %2293 = vmatprep.subr.bf16.mxu0 %v2567_v14 }
 0x98b   :  { %989 = vadd.xlane.f32.xlu1 %v988_v32 }
 0x98d   :  { %2294 = vmatpush3.bf16.msra.mxu0 %v2454_v46 }
 0x98e   :  { %2299 = vmatprep.subr.bf16.mxu0 %v2567_v14 }
 0xa10   :  { %v987_v33 = vpop.xlane.xlu0 %986 }
 0xa11   :  { %v991_v34 = vmul.f32 0.03125, %v987_v33 }
 0xa13   :  { %v993_v35 = vsub.f32 %v983_v20, %v991_v34 }
 0xa14   :  { %v990_v26 = vpop.xlane.xlu1 %989 }
 0xa15   :  { %v992_v41 = vmul.f32 0.03125, %v990_v26  ;;  %v995_v42 = vmul.f32 %v993_v35, %v993_v35 }
 0xa17   :  { %v994_v43 = vsub.f32 %v984_v31, %v992_v41  ;;  %v997_v38 = vsel %vm63_vm0, %v995_v42, 0.0 }
 0xa18   :  { %998 = vadd.xlane.f32.xlu0 %v997_v38 }
 0xa19   :  { %v996_v44 = vmul.f32 %v994_v43, %v994_v43 }
 0xa1b   :  { %v1000_v45 = vsel %vm63_vm0, %v996_v44, 0.0 }
 0xa1c   :  { %1001 = vadd.xlane.f32.xlu1 %v1000_v45 }
 0xaa1   :  { %v999_v48 = vpop.xlane.xlu0 %998 }
 0xaa2   :  { %v1003_v49 = vmul.f32 0.03125, %v999_v48 }
 0xaa4   :  { %v1005_v50 = vadd.f32 1e-12, %v1003_v49 }
 0xaa5   :  { %v1002_v52 = vpop.xlane.xlu1 %1001 }
 0xaa6   :  { %2513 = vrsqrt.f32 %v1005_v50  ;;  %v1004_v47 = vmul.f32 0.03125, %v1002_v52 }
 0xaa8   :  { %v1006_v53 = vadd.f32 1e-12, %v1004_v47 }
 0xaaa   :  { %2515 = vrsqrt.f32 %v1006_v53 }
 0xab3   :  { %v2514_v56 = vpop.eup %2513 }
 0xab4   :  { %v1009_v57 = vmul.f32 %v2514_v56, %v993_v35 }
 0xab6   :  { %v1015_v61 = vmul.f32 %v1014_v58, %v1009_v57 }
 0xab7   :  { %v2516_v59 = vpop.eup %2515 }
 0xab8   :  { %v1010_v60 = vmul.f32 %v2516_v59, %v994_v43  ;;  %v2904_v0 = vadd.f32 %v1020_v62, %v1015_v61 }
 0xaba   :  { %v1016_v63 = vmul.f32 %v1014_v58, %v1010_v60 }
 0xabc   :  { %v2906_v1 = vadd.f32 %v1020_v62, %v1016_v63 }
 0xabe   :  { %v1023_v2 = vpack.c.bf16 %v2906_v1, %v2904_v0 }
 0xac0   :  { %2296 = vmatmul.mubr.msk.bf16.vlgmr.msra.gmra.mxu0 %vm63_vm0, %v1023_v2 }
 0xac1   :  { %2301 = vmatprep.mubr.msk.bf16.mxu0 %vm2568_vm1, %v2567_v14 }
 0xb80   :  { %v1082_v3 = vpop.f32.mrf.mxu0 }
 0xb81   :  { %v1083_v7 = vadd.f32 %v1082_v3, %v1032_v4 }
 0xb82   :  { %v2297_v5 = vpop.f32.mrf.mxu0 }
 0xb84   :  { %v1085_v6 = vpop.f32.mrf.mxu0 }
 0xb85   :  { %v1086_v8 = vadd.f32 %v1085_v6, %v1032_v4 }
 0xb86   :  { %v2298_v9 = vpop.f32.mrf.mxu0 }
 0xb87   :  { %v2915_v36 = vpack.c.bf16 %v1086_v8, %v1083_v7 }
 0xb89   :  { %1091 = vrot.lane.b32.xlu0 %v2915_v36, %s2570_s15 }
 0xb8d   :  { %1212 = vrot.lane.b32.xlu0 %v2915_v36, %s2569_s14 }
 0xb91   :  { %1210 = vrot.lane.b32.xlu0 %v2915_v36, %s2571_s16 }
 0xb95   :  { %1333 = vrot.lane.b32.xlu0 %v2915_v36, %s2573_s18 }
 0xb99   :  { %1454 = vrot.lane.b32.xlu0 %v2915_v36, %s2575_s20 }
 0xbfb   :  { %v1092_v10 = vpop.permute.xlu0 %1091 }
 0xbfc   :  { %v1097_v12 = vsel %vm172_vm2, %v1092_v10, 0 }
 0xbfd   :  { %2300 = vmatpush3.bf16.xpose.msra.mxu0 %v1097_v12 }
 0xbfe   :  { %2305 = vmatprep.subr.bf16.mxu0 %v2567_v14 }
 0xbff   :  { %v1213_v40 = vpop.permute.xlu0 %1212 }
 0xc00   :  { %v1218_v47 = vsel %vm172_vm2, %v1213_v40, 0 }
 0xc03   :  { %v1211_v52 = vpop.permute.xlu0 %1210 }
 0xc04   :  { %2302 = vmatmul.mubr.msk.bf16.vlgmr.msra.gmra.mxu0 %vm172_vm2, %v2915_v36 }
 0xc05   :  { %2307 = vmatprep.mubr.msk.bf16.mxu0 %vm2568_vm1, %v2567_v14 }
 0xc07   :  { %v1334_v53 = vpop.permute.xlu0 %1333 }
 0xc08   :  { %v1339_v56 = vsel %vm172_vm2, %v1334_v53, 0 }
 0xc0b   :  { %v1455_v57 = vpop.permute.xlu0 %1454 }
 0xc0c   :  { %v1460_v59 = vsel %vm172_vm2, %v1455_v57, 0 }
 0xcc4   :  { %v1133_v37 = vpop.f32.mrf.mxu0 }
 0xcc5   :  { %v1134_v15 = vadd.f32 %v1133_v37, %v2730_v11 }
 0xcc6   :  { %v2303_v17 = vpop.f32.mrf.mxu0 }
 0xcc7   :  { %v1140_v18 = vsel %vm220_vm9, %v1134_v15, -inf }
 0xcc8   :  { %1141 = vmax.xlane.f32.xlu1 %v1140_v18  ;;  %v1136_v19 = vpop.f32.mrf.mxu0 }
 0xcc9   :  { %v1137_v20 = vadd.f32 %v1136_v19, %v2733_v16 }
 0xcca   :  { %v2304_v21 = vpop.f32.mrf.mxu0 }
 0xccb   :  { %v1143_v23 = vsel %vm220_vm9, %v1137_v20, -inf }
 0xccc   :  { %1144 = vmax.xlane.f32.xlu1 %v1143_v23 }
 0xd51   :  { %v1142_v27 = vpop.xlane.xlu1 %1141 }
 0xd52   :  { %v1146_v28 = vsub.f32 %v1134_v15, %v1142_v27 }
 0xd54   :  { %v1148_v31 = vmul.f32 1.442695, %v1146_v28 }
 0xd55   :  { %v1145_v32 = vpop.xlane.xlu1 %1144 }
 0xd56   :  { %2517 = vpow2.f32 %v1148_v31  ;;  %v1147_v33 = vsub.f32 %v1137_v20, %v1145_v32 }
 0xd58   :  { %v1150_v34 = vmul.f32 1.442695, %v1147_v33 }
 0xd5a   :  { %2519 = vpow2.f32 %v1150_v34 }
 0xd63   :  { %v2518_v35 = vpop.eup %2517 }
 0xd64   :  { %v1152_v26 = vsel %vm220_vm9, %v2518_v35, 0.0 }
 0xd65   :  { %1153 = vadd.xlane.f32.xlu1 %v1152_v26 }
 0xd67   :  { %v2520_v41 = vpop.eup %2519 }
 0xd68   :  { %v1155_v42 = vsel %vm220_vm9, %v2520_v41, 0.0 }
 0xd69   :  { %1156 = vadd.xlane.f32.xlu1 %v1155_v42 }
 0xd7a   :  { %1163 = vrot.lane.b32.xlu1 %v2915_v36, %s2578_s1 }
 0xd7e   :  { %1331 = vrot.lane.b32.xlu1 %v2915_v36, %s2572_s17 }
 0xd82   :  { %1452 = vrot.lane.b32.xlu1 %v2915_v36, %s2574_s19 }
 0xdee   :  { %v1154_v43 = vpop.xlane.xlu1 %1153 }
 0xdef   :  { %2521 = vrcp.f32 %v1154_v43 }
 0xdf2   :  { %v1157_v38 = vpop.xlane.xlu1 %1156 }
 0xdf3   :  { %2523 = vrcp.f32 %v1157_v38 }
 0xdf6   :  { %v1164_v44 = vpop.permute.xlu1 %1163 }
 0xdf7   :  { %2306 = vmatpush3.bf16.msra.mxu0 %v1164_v44 }
 0xdf8   :  { %2311 = vmatprep.subr.bf16.mxu0 %v2567_v14 }
 0xdfa   :  { %v1332_v58 = vpop.permute.xlu1 %1331 }
 0xdfc   :  { %v2522_v45 = vpop.eup %2521 }
 0xdfd   :  { %v1160_v48 = vmul.f32 %v2522_v45, %v2518_v35 }
 0xdfe   :  { %v1453_v60 = vpop.permute.xlu1 %1452 }
 0xe00   :  { %v2524_v46 = vpop.eup %2523 }
 0xe01   :  { %v1161_v49 = vmul.f32 %v2524_v46, %v2520_v41 }
 0xe03   :  { %v1162_v50 = vpack.c.bf16 %v1161_v49, %v1160_v48 }
 0xe05   :  { %2308 = vmatmul.mubr.msk.bf16.vlgmr.msra.gmra.mxu0 %vm220_vm9, %v1162_v50 }
 0xe06   :  { %2312 = vmatpush3.bf16.xpose.msra.mxu0 %v1218_v47  ;;  %2313 = vmatprep.mubr.msk.bf16.mxu0 %vm2568_vm1, %v2567_v14 }
 0xe07   :  { %2323 = vmatprep.subr.bf16.mxu0 %v2567_v14 }
 0xe0d   :  { %2314 = vmatmul.mubr.msk.bf16.vlgmr.msra.gmra.mxu0 %vm172_vm2, %v1211_v52 }
 0xe0e   :  { %2324 = vmatpush3.bf16.xpose.msra.mxu0 %v1339_v56  ;;  %2325 = vmatprep.mubr.msk.bf16.mxu0 %vm2568_vm1, %v2567_v14 }
 0xe0f   :  { %2335 = vmatprep.subr.bf16.mxu0 %v2567_v14 }
 0xe15   :  { %2326 = vmatmul.mubr.msk.bf16.vlgmr.msra.gmra.mxu0 %vm172_vm2, %v1332_v58 }
 0xe16   :  { %2336 = vmatpush3.bf16.xpose.msra.mxu0 %v1460_v59  ;;  %2337 = vmatprep.mubr.msk.bf16.mxu0 %vm2568_vm1, %v2567_v14 }
 0xe17   :  { %2347 = vmatprep.subr.bf16.mxu0 %v2567_v14 }
 0xe1d   :  { %2338 = vmatmul.mubr.msk.bf16.vlgmr.msra.gmra.mxu0 %vm172_vm2, %v1453_v60 }
 0xe1e   :  { %2351 = vmatprep.mubr.msk.bf16.mxu0 %vm2568_vm1, %v2567_v14 }
 0xec5   :  { %v2964_v61 = vpop.f32.mrf.mxu0 }
 0xec7   :  { %v2309_v62 = vpop.f32.mrf.mxu0 }
 0xec9   :  { %v2966_v63 = vpop.f32.mrf.mxu0 }
 0xecb   :  { %v2310_v2 = vpop.f32.mrf.mxu0 }
 0xecd   :  { %v1254_v3 = vpop.f32.mrf.mxu0 }
 0xece   :  { %v1255_v4 = vadd.f32 %v1254_v3, %v2730_v11 }
 0xecf   :  { %v2315_v5 = vpop.f32.mrf.mxu0 }
 0xed0   :  { %v1261_v6 = vsel %vm220_vm9, %v1255_v4, -inf }
 0xed1   :  { %1262 = vmax.xlane.f32.xlu0 %v1261_v6  ;;  %v1257_v7 = vpop.f32.mrf.mxu0 }
 0xed2   :  { %v1258_v8 = vadd.f32 %v1257_v7, %v2733_v16 }
 0xed3   :  { %v2316_v9 = vpop.f32.mrf.mxu0 }
 0xed4   :  { %v1264_v10 = vsel %vm220_vm9, %v1258_v8, -inf }
 0xed5   :  { %1265 = vmax.xlane.f32.xlu1 %v1264_v10  ;;  %v1375_v12 = vpop.f32.mrf.mxu0 }
 0xed6   :  { %v1376_v37 = vadd.f32 %v1375_v12, %v2730_v11 }
 0xed7   :  { %v2327_v15 = vpop.f32.mrf.mxu0 }
 0xed8   :  { %v1382_v17 = vsel %vm220_vm9, %v1376_v37, -inf }
 0xed9   :  { %1383 = vmax.xlane.f32.xlu0 %v1382_v17  ;;  %v1378_v18 = vpop.f32.mrf.mxu0 }
 0xeda   :  { %v1379_v19 = vadd.f32 %v1378_v18, %v2733_v16 }
 0xedb   :  { %v2328_v20 = vpop.f32.mrf.mxu0 }
 0xedc   :  { %v1385_v21 = vsel %vm220_vm9, %v1379_v19, -inf }
 0xedd   :  { %1386 = vmax.xlane.f32.xlu0 %v1385_v21  ;;  %v1496_v23 = vpop.f32.mrf.mxu0 }
 0xede   :  { %v1497_v27 = vadd.f32 %v1496_v23, %v2730_v11 }
 0xedf   :  { %v2339_v28 = vpop.f32.mrf.mxu0 }
 0xee0   :  { %v1503_v31 = vsel %vm220_vm9, %v1497_v27, -inf }
 0xee1   :  { %1504 = vmax.xlane.f32.xlu0 %v1503_v31  ;;  %v1499_v32 = vpop.f32.mrf.mxu0 }
 0xee2   :  { %v1500_v33 = vadd.f32 %v1499_v32, %v2733_v16 }
 0xee3   :  { %v2340_v34 = vpop.f32.mrf.mxu0 }
 0xee4   :  { %v1506_v35 = vsel %vm220_vm9, %v1500_v33, -inf }
 0xee5   :  { %1507 = vmax.xlane.f32.xlu1 %v1506_v35 }
 0xf5a   :  { %v1263_v26 = vpop.xlane.xlu0 %1262 }
 0xf5b   :  { %v1267_v41 = vsub.f32 %v1255_v4, %v1263_v26 }
 0xf5d   :  { %v1269_v42 = vmul.f32 1.442695, %v1267_v41 }
 0xf5e   :  { %v1266_v43 = vpop.xlane.xlu1 %1265 }
 0xf5f   :  { %2525 = vpow2.f32 %v1269_v42  ;;  %v1268_v38 = vsub.f32 %v1258_v8, %v1266_v43 }
 0xf61   :  { %v1271_v44 = vmul.f32 1.442695, %v1268_v38 }
 0xf62   :  { %v1384_v45 = vpop.xlane.xlu0 %1383 }
 0xf63   :  { %2527 = vpow2.f32 %v1271_v44  ;;  %v1388_v11 = vsub.f32 %v1376_v37, %v1384_v45 }
 0xf65   :  { %v1390_v40 = vmul.f32 1.442695, %v1388_v11 }
 0xf66   :  { %v1387_v46 = vpop.xlane.xlu0 %1386 }
 0xf67   :  { %2529 = vpow2.f32 %v1390_v40  ;;  %v1389_v48 = vsub.f32 %v1379_v19, %v1387_v46  ;;  %v2455_v40 = vld [vmem:[%s3118_s4 + $0x18] sm:$0xff]  }
 0xf68   :  { %2348 = vmatpush3.bf16.msra.mxu0 %v2455_v40 }
 0xf69   :  { %v1392_v49 = vmul.f32 1.442695, %v1389_v48  ;;  %2349 = vmatprep.subr.bf16.mxu0 %v2567_v14 }
 0xf6a   :  { %v1505_v16 = vpop.xlane.xlu0 %1504 }
 0xf6b   :  { %2531 = vpow2.f32 %v1392_v49  ;;  %v1509_v50 = vsub.f32 %v1497_v27, %v1505_v16 }
 0xf6c   :  { %v2526_v52 = vpop.eup %2525 }
 0xf6d   :  { %v1511_v47 = vmul.f32 1.442695, %v1509_v50  ;;  %v1273_v53 = vsel %vm220_vm9, %v2526_v52, 0.0 }
 0xf6e   :  { %1274 = vadd.xlane.f32.xlu0 %v1273_v53  ;;  %v1508_v4 = vpop.xlane.xlu1 %1507  ;;  %v2456_v53 = vld [vmem:[%s3118_s4 + $0x10] sm:$0xff]  }
 0xf6f   :  { %2533 = vpow2.f32 %v1511_v47  ;;  %v1510_v5 = vsub.f32 %v1500_v33, %v1508_v4  ;;  %2350 = vmatpush3.bf16.msra.mxu0 %v2456_v53  ;;  %v1700_v53 = vrot.slane %v2898_v54, %v2822_v22 }
 0xf70   :  { %v2528_v56 = vpop.eup %2527  ;;  %2363 = vmatprep.subr.bf16.mxu0 %v2567_v14 }
 0xf71   :  { %v1276_v57 = vsel %vm220_vm9, %v2528_v56, 0.0  ;;  %v1513_v6 = vmul.f32 1.442695, %v1510_v5 }
 0xf72   :  { %1277 = vadd.xlane.f32.xlu1 %v1276_v57 }
 0xf73   :  { %2535 = vpow2.f32 %v1513_v6 }
 0xf74   :  { %v2530_v58 = vpop.eup %2529 }
 0xf75   :  { %v1394_v59 = vsel %vm220_vm9, %v2530_v58, 0.0 }
 0xf76   :  { %1395 = vadd.xlane.f32.xlu0 %v1394_v59 }
 0xf78   :  { %v2532_v60 = vpop.eup %2531 }
 0xf79   :  { %v1397_v62 = vsel %vm220_vm9, %v2532_v60, 0.0 }
 0xf7a   :  { %1398 = vadd.xlane.f32.xlu1 %v1397_v62 }
 0xf7c   :  { %v2534_v2 = vpop.eup %2533 }
 0xf7d   :  { %v1515_v3 = vsel %vm220_vm9, %v2534_v2, 0.0 }
 0xf7e   :  { %1516 = vadd.xlane.f32.xlu0 %v1515_v3 }
 0xf80   :  { %v2536_v7 = vpop.eup %2535 }
 0xf81   :  { %v1518_v8 = vsel %vm220_vm9, %v2536_v7, 0.0 }
 0xf8b   :  { %1405 = vrot.lane.b32.xlu1 %v2915_v36, %s2579_s23 }
 0xf94   :  { %1284 = vrot.lane.b32.xlu0 %v2915_v36, %s2581_s25 }
 0xfaf   :  { %1519 = vadd.xlane.f32.xlu1 %v1518_v8 }
 0xfc0   :  { %1526 = vrot.lane.b32.xlu1 %v2915_v36, %s2580_s24 }
 0xff7   :  { %v1275_v9 = vpop.xlane.xlu0 %1274 }
 0xff8   :  { %2537 = vrcp.f32 %v1275_v9 }
 0xffb   :  { %v1278_v10 = vpop.xlane.xlu1 %1277 }
 0xffc   :  { %2539 = vrcp.f32 %v1278_v10 }
 0xfff   :  { %v1396_v12 = vpop.xlane.xlu0 %1395 }
0x1000   :  { %2541 = vrcp.f32 %v1396_v12 }
0x1003   :  { %v1399_v37 = vpop.xlane.xlu1 %1398 }
0x1004   :  { %2543 = vrcp.f32 %v1399_v37 }
0x1005   :  { %v2538_v15 = vpop.eup %2537 }
0x1006   :  { %v1281_v19 = vmul.f32 %v2538_v15, %v2526_v52 }
0x1007   :  { %v1517_v17 = vpop.xlane.xlu0 %1516  ;;  %v1406_v36 = vpop.permute.xlu1 %1405 }
0x1008   :  { %2545 = vrcp.f32 %v1517_v17 }
0x1009   :  { %v2540_v18 = vpop.eup %2539 }
0x100a   :  { %v1282_v20 = vmul.f32 %v2540_v18, %v2528_v56 }
0x100b   :  { %v1285_v21 = vpop.permute.xlu0 %1284 }
0x100c   :  { %2318 = vmatpush3.bf16.msra.mxu1 %v1285_v21  ;;  %v1283_v23 = vpack.c.bf16 %v1282_v20, %v1281_v19 }
0x100d   :  { %2329 = vmatprep.subr.bf16.mxu1 %v2567_v14  ;;  %v2542_v27 = vpop.eup %2541 }
0x100e   :  { %v1402_v31 = vmul.f32 %v2542_v27, %v2530_v58 }
0x100f   :  { %2320 = vmatmul.mubr.msk.bf16.vlgmr.msra.gmra.mxu1 %vm220_vm9, %v1283_v23 }
0x1010   :  { %2330 = vmatpush3.bf16.msra.mxu1 %v1406_v36  ;;  %2331 = vmatprep.mubr.msk.bf16.mxu1 %vm2568_vm1, %v2567_v14 }
0x1011   :  { %v2544_v28 = vpop.eup %2543  ;;  %2341 = vmatprep.subr.bf16.mxu1 %v2567_v14 }
0x1012   :  { %v1403_v32 = vmul.f32 %v2544_v28, %v2532_v60 }
0x1014   :  { %v1404_v33 = vpack.c.bf16 %v1403_v32, %v1402_v31 }
0x1015   :  { %v2546_v26 = vpop.eup %2545 }
0x1016   :  { %v1523_v42 = vmul.f32 %v2546_v26, %v2534_v2 }
0x1017   :  { %2332 = vmatmul.mubr.msk.bf16.vlgmr.msra.gmra.mxu1 %vm220_vm9, %v1404_v33 }
0x1018   :  { %2343 = vmatprep.mubr.msk.bf16.mxu1 %vm2568_vm1, %v2567_v14 }
0x1038   :  { %v1520_v34 = vpop.xlane.xlu1 %1519 }
0x1039   :  { %2547 = vrcp.f32 %v1520_v34 }
0x103c   :  { %v1527_v35 = vpop.permute.xlu1 %1526 }
0x103d   :  { %2342 = vmatpush3.bf16.msra.mxu1 %v1527_v35 }
0x103e   :  { %2355 = vmatprep.subr.bf16.mxu1 %v2567_v14 }
0x1046   :  { %v2548_v41 = vpop.eup %2547 }
0x1047   :  { %v1524_v43 = vmul.f32 %v2548_v41, %v2536_v7 }
0x1049   :  { %v1525_v38 = vpack.c.bf16 %v1524_v43, %v1523_v42 }
0x104b   :  { %2344 = vmatmul.mubr.msk.bf16.vlgmr.msra.gmra.mxu1 %vm220_vm9, %v1525_v38 }
0x104c   :  { %2359 = vmatprep.mubr.msk.bf16.mxu1 %vm2568_vm1, %v2567_v14 }
0x10cf   :  { %v1324_v44 = vpop.f32.mrf.mxu1 }
0x10d1   :  { %v2321_v45 = vpop.f32.mrf.mxu1 }
0x10d3   :  { %v1327_v11 = vpop.f32.mrf.mxu1 }
0x10d4   :  { %v2424_v46 = vpack.i.bf16 %v1327_v11, %v1324_v44  ;;  %v2458_v11 = vld [vmem:[%s3119_s5 + $0x10] sm:$0xff]  }
0x10d5   :  { %v2322_v48 = vpop.f32.mrf.mxu1 }
0x10d6   :  { %2425 = vrot.lane.b32.xlu1 %v2424_v46, %s2582_s28 }
0x10d7   :  { %v1445_v49 = vpop.f32.mrf.mxu1 }
0x10d9   :  { %v2333_v16 = vpop.f32.mrf.mxu1 }
0x10db   :  { %v1448_v50 = vpop.f32.mrf.mxu1 }
0x10dc   :  { %v2429_v52 = vpack.i.bf16 %v1448_v50, %v1445_v49 }
0x10dd   :  { %v2334_v47 = vpop.f32.mrf.mxu1 }
0x10de   :  { %2430 = vrot.lane.b32.xlu0 %v2429_v52, %s2583_s0 }
0x110b   :  { %v1566_v56 = vpop.f32.mrf.mxu1 }
0x110d   :  { %v2345_v57 = vpop.f32.mrf.mxu1 }
0x110f   :  { %v1569_v58 = vpop.f32.mrf.mxu1 }
0x1110   :  { %v2434_v59 = vpack.i.bf16 %v1569_v58, %v1566_v56 }
0x1111   :  { %v2346_v60 = vpop.f32.mrf.mxu1 }
0x1112   :  { %2435 = vrot.lane.b32.xlu1 %v2434_v59, %s2584_s9  ;;  %v1706_v59 = vrot.slane %v2898_v54, %v786_v29  ;;  %v2460_v29 = vld [vmem:[%s3120_s6 + $0x70] sm:$0xff]  }
0x1148   :  { %v2426_v62 = vpop.permute.xlu1 %2425 }
0x1149   :  { %v2428_v3 = vunpack.i.h.bf16 %v2426_v62  ;;  %v2427_v4 = vunpack.i.l.bf16 %v2426_v62 }
0x114b   :  { %v1598_v8 = vsel %vm172_vm2, %v2966_v63, %v2428_v3  ;;  %v1597_v9 = vsel %vm172_vm2, %v2964_v61, %v2427_v4  ;;  %v1612_v63 = vrot.slane %v2898_v54, %v2803_v55  ;;  %v2459_v4 = vld [vmem:[%s3120_s6 + $0x78] sm:$0xff]  }
0x1150   :  { %v2431_v2 = vpop.permute.xlu0 %2430 }
0x1151   :  { %v2433_v5 = vunpack.i.h.bf16 %v2431_v2  ;;  %v2432_v6 = vunpack.i.l.bf16 %v2431_v2 }
0x1153   :  { %v1600_v37 = vsel %vm220_vm9, %v1598_v8, %v2433_v5  ;;  %v1599_v15 = vsel %vm220_vm9, %v1597_v9, %v2432_v6  ;;  %v2461_v5 = vld [vmem:[%s3120_s6 + $0x68] sm:$0xff]   ;;  %v2462_v6 = vld [vmem:[%s3120_s6 + $0x60] sm:$0xff]   ;;  %v2464_v8 = vld [vmem:[%s3120_s6 + $0x50] sm:$0xff]  }
0x1154   :  { %v2465_v9 = vld [vmem:[%s3120_s6 + $0x48] sm:$0xff]  }
0x1184   :  { %v2436_v7 = vpop.permute.xlu1 %2435 }
0x1185   :  { %v2438_v10 = vunpack.i.h.bf16 %v2436_v7  ;;  %v2437_v12 = vunpack.i.l.bf16 %v2436_v7  ;;  %v2463_v7 = vld [vmem:[%s3120_s6 + $0x58] sm:$0xff]  }
0x1187   :  { %v1602_v17 = vsel %vm682_vm10, %v1600_v37, %v2438_v10  ;;  %v1601_v18 = vsel %vm682_vm10, %v1599_v15, %v2437_v12  ;;  %v2466_v10 = vld [vmem:[%s3120_s6 + $0x40] sm:$0xff]   ;;  %v1718_v12 = vrot.slane %v2898_v54, %v797_v51 }
0x1188   :  { %v1603_v19 = vpack.c.bf16 %v1602_v17, %v1601_v18 }
0x118a   :  { %2352 = vmatmul.mubr.msk.bf16.vlgmr.msra.gmra.mxu0 %vm63_vm0, %v1603_v19 }
0x118b   :  { %2379 = vmatprep.mubr.msk.bf16.mxu0 %vm2568_vm1, %v2567_v14  ;;  %2364 = vmatpush3.bf16.msra.mxu0 %v2459_v4 }
0x118c   :  { %2365 = vmatprep.subr.bf16.mxu0 %v2567_v14 }
0x118f   :  { %2366 = vmatpush3.bf16.msra.mxu0 %v2460_v29 }
0x1190   :  { %2367 = vmatprep.subr.bf16.mxu0 %v2567_v14 }
0x1193   :  { %2368 = vmatpush3.bf16.msra.mxu0 %v2461_v5 }
0x1194   :  { %2369 = vmatprep.subr.bf16.mxu0 %v2567_v14 }
0x1197   :  { %2370 = vmatpush3.bf16.msra.mxu0 %v2462_v6 }
0x1198   :  { %2371 = vmatprep.subr.bf16.mxu0 %v2567_v14 }
0x119b   :  { %2372 = vmatpush3.bf16.msra.mxu0 %v2463_v7 }
0x119c   :  { %2373 = vmatprep.subr.bf16.mxu0 %v2567_v14 }
0x119f   :  { %2374 = vmatpush3.bf16.msra.mxu0 %v2464_v8  ;;  %v32_v8 = vld [vmem:[%s3116_s2 + $0x10] sm:$0xff] }
0x11a0   :  { %2375 = vmatprep.subr.bf16.mxu0 %v2567_v14 }
0x11a3   :  { %2376 = vmatpush3.bf16.msra.mxu0 %v2465_v9  ;;  %v1935_v9 = vrot.slane %v32_v8, %v2658_v25  ;;  %v1953_v25 = vrot.slane %v32_v8, %v2682_v39 }
0x11a4   :  { %2377 = vmatprep.subr.bf16.mxu0 %v2567_v14 }
0x11a7   :  { %2378 = vmatpush3.bf16.msra.mxu0 %v2466_v10 }
0x124a   :  { %v1662_v61 = vpop.f32.mrf.mxu0 }
0x124b   :  { %v1663_v20 = vadd.f32 %v1662_v61, %v1612_v63 }
0x124c   :  { %v2353_v21 = vpop.f32.mrf.mxu0 }
0x124d   :  { %v1669_v23 = vadd.f32 %v1663_v20, %v2904_v0 }
0x124e   :  { %v1665_v27 = vpop.f32.mrf.mxu0 }
0x124f   :  { %v1666_v36 = vadd.f32 %v1665_v27, %v1612_v63  ;;  %v1671_v28 = vsel %vm63_vm0, %v1669_v23, 0.0 }
0x1250   :  { %1672 = vadd.xlane.f32.xlu0 %v1671_v28  ;;  %v2354_v31 = vpop.f32.mrf.mxu0 }
0x1251   :  { %v1670_v32 = vadd.f32 %v1666_v36, %v2906_v1  ;;  %v2457_v1 = vld [vmem:[%s3119_s5 + $0x18] sm:$0xff]  }
0x1252   :  { %2356 = vmatpush3.bf16.msra.mxu1 %v2457_v1 }
0x1253   :  { %v1674_v33 = vsel %vm63_vm0, %v1670_v32, 0.0  ;;  %2357 = vmatprep.subr.bf16.mxu1 %v2567_v14 }
0x1254   :  { %1675 = vadd.xlane.f32.xlu1 %v1674_v33 }
0x1256   :  { %2358 = vmatpush3.bf16.msra.mxu1 %v2458_v11 }
0x1257   :  { %2383 = vmatprep.subr.bf16.mxu1 %v2567_v14 }
0x12d9   :  { %v1673_v34 = vpop.xlane.xlu0 %1672 }
0x12da   :  { %v1677_v35 = vmul.f32 0.03125, %v1673_v34 }
0x12dc   :  { %v1679_v26 = vsub.f32 %v1669_v23, %v1677_v35 }
0x12dd   :  { %v1676_v41 = vpop.xlane.xlu1 %1675 }
0x12de   :  { %v1678_v42 = vmul.f32 0.03125, %v1676_v41  ;;  %v1681_v43 = vmul.f32 %v1679_v26, %v1679_v26 }
0x12e0   :  { %v1680_v38 = vsub.f32 %v1670_v32, %v1678_v42  ;;  %v1683_v0 = vsel %vm63_vm0, %v1681_v43, 0.0 }
0x12e1   :  { %1684 = vadd.xlane.f32.xlu0 %v1683_v0 }
0x12e2   :  { %v1682_v44 = vmul.f32 %v1680_v38, %v1680_v38 }
0x12e4   :  { %v1686_v45 = vsel %vm63_vm0, %v1682_v44, 0.0  ;;  %v1814_v44 = vrot.slane %v2898_v54, %v892_v13 }
0x12e5   :  { %1687 = vadd.xlane.f32.xlu0 %v1686_v45 }
0x136a   :  { %v1685_v40 = vpop.xlane.xlu0 %1684 }
0x136b   :  { %v1689_v46 = vmul.f32 0.03125, %v1685_v40 }
0x136d   :  { %v1691_v48 = vadd.f32 1e-12, %v1689_v46 }
0x136e   :  { %v1688_v49 = vpop.xlane.xlu0 %1687 }
0x136f   :  { %2549 = vrsqrt.f32 %v1691_v48  ;;  %v1690_v16 = vmul.f32 0.03125, %v1688_v49 }
0x1371   :  { %v1692_v50 = vadd.f32 1e-12, %v1690_v16 }
0x1373   :  { %2551 = vrsqrt.f32 %v1692_v50 }
0x137c   :  { %v2550_v52 = vpop.eup %2549 }
0x137d   :  { %v1695_v47 = vmul.f32 %v2550_v52, %v1679_v26 }
0x137f   :  { %v1701_v58 = vmul.f32 %v1700_v53, %v1695_v47 }
0x1380   :  { %v2552_v56 = vpop.eup %2551 }
0x1381   :  { %v1696_v57 = vmul.f32 %v2552_v56, %v1680_v38  ;;  %v1707_v62 = vadd.f32 %v1706_v59, %v1701_v58 }
0x1383   :  { %v1702_v60 = vmul.f32 %v1700_v53, %v1696_v57 }
0x1385   :  { %v3047_v2 = vadd.f32 %v1706_v59, %v1702_v60 }
0x1387   :  { %v1709_v3 = vpack.c.bf16 %v3047_v2, %v1707_v62 }
0x1389   :  { %2360 = vmatmul.mubr.msk.bf16.vlgmr.msra.gmra.mxu1 %vm63_vm0, %v1709_v3 }
0x138a   :  { %2387 = vmatprep.mubr.msk.bf16.mxu1 %vm2568_vm1, %v2567_v14 }
0x1449   :  { %v1768_v37 = vpop.f32.mrf.mxu1 }
0x144a   :  { %v1769_v15 = vadd.f32 %v1768_v37, %v1718_v12 }
0x144b   :  { %v2361_v17 = vpop.f32.mrf.mxu1 }
0x144c   :  { %v1777_v18 = vmul.f32 0.044715, %v1769_v15  ;;  %v1775_v26 = vmul.f32 0.5, %v1769_v15 }
0x144d   :  { %v1771_v19 = vpop.f32.mrf.mxu1 }
0x144e   :  { %v1779_v63 = vmul.f32 %v1777_v18, %v1769_v15  ;;  %v1772_v61 = vadd.f32 %v1771_v19, %v1718_v12 }
0x144f   :  { %v2362_v20 = vpop.f32.mrf.mxu1 }
0x1450   :  { %v1781_v21 = vmul.f32 %v1779_v63, %v1769_v15  ;;  %v1778_v23 = vmul.f32 0.044715, %v1772_v61  ;;  %v1776_v41 = vmul.f32 0.5, %v1772_v61 }
0x1452   :  { %v1783_v27 = vadd.f32 %v1781_v21, %v1769_v15  ;;  %v1780_v36 = vmul.f32 %v1778_v23, %v1772_v61 }
0x1454   :  { %v1785_v28 = vmul.f32 0.7978846, %v1783_v27  ;;  %v1782_v31 = vmul.f32 %v1780_v36, %v1772_v61 }
0x1456   :  { %2553 = vtanh.f32 %v1785_v28  ;;  %v1784_v32 = vadd.f32 %v1782_v31, %v1772_v61 }
0x1458   :  { %v1786_v33 = vmul.f32 0.7978846, %v1784_v32 }
0x145a   :  { %2555 = vtanh.f32 %v1786_v33 }
0x1463   :  { %v2554_v34 = vpop.eup %2553 }
0x1464   :  { %v1789_v51 = vadd.f32 1.0, %v2554_v34 }
0x1466   :  { %v1791_v43 = vmul.f32 %v1789_v51, %v1775_v26  ;;  %v2021_v51 = vrot.slane %v32_v8, %v2803_v55 }
0x1467   :  { %v2556_v35 = vpop.eup %2555 }
0x1468   :  { %v1790_v42 = vadd.f32 1.0, %v2556_v35 }
0x146a   :  { %v1792_v38 = vmul.f32 %v1790_v42, %v1776_v41  ;;  %v2030_v42 = vrot.slane %v32_v8, %v2822_v22 }
0x146c   :  { %v1793_v0 = vpack.c.bf16 %v1792_v38, %v1791_v43 }
0x146e   :  { %2380 = vmatmul.mubr.bf16.vlgmr.msra.gmra.mxu0 %v1793_v0 }
0x152e   :  { %v1897_v45 = vpop.f32.mrf.mxu0 }
0x152f   :  { %v1898_v1 = vadd.f32 %v1897_v45, %v1814_v44 }
0x1530   :  { %v2381_v11 = vpop.f32.mrf.mxu0 }
0x1531   :  { %v1904_v40 = vadd.f32 %v1898_v1, %v1707_v62  ;;  %v2467_v62 = vld [vmem:[%s3121_s7 + $0x8] sm:$0xff]  }
0x1532   :  { %v1900_v46 = vpop.f32.mrf.mxu0  ;;  %2384 = vmatpush3.bf16.msra.mxu1 %v2467_v62 }
0x1533   :  { %v1901_v48 = vadd.f32 %v1900_v46, %v1814_v44  ;;  %v1906_v49 = vsel %vm63_vm0, %v1904_v40, 0.0  ;;  %2385 = vmatprep.subr.bf16.mxu1 %v2567_v14  ;;  %v1941_v14 = vrot.slane %v32_v8, %v2668_v30 }
0x1534   :  { %1907 = vadd.xlane.f32.xlu1 %v1906_v49  ;;  %v2382_v16 = vpop.f32.mrf.mxu0 }
0x1535   :  { %v1905_v50 = vadd.f32 %v1901_v48, %v3047_v2  ;;  %v2468_v2 = vld [vmem:[%s3121_s7] sm:$0xff]  }
0x1536   :  { %2386 = vmatpush3.bf16.msra.mxu1 %v2468_v2 }
0x1537   :  { %v1909_v52 = vsel %vm63_vm0, %v1905_v50, 0.0 }
0x1538   :  { %1910 = vadd.xlane.f32.xlu0 %v1909_v52 }
0x15bd   :  { %v1908_v47 = vpop.xlane.xlu1 %1907 }
0x15be   :  { %v1912_v53 = vmul.f32 0.03125, %v1908_v47 }
0x15c0   :  { %v1914_v24 = vsub.f32 %v1904_v40, %v1912_v53 }
0x15c1   :  { %v1911_v56 = vpop.xlane.xlu0 %1910 }
0x15c2   :  { %v1913_v13 = vmul.f32 0.03125, %v1911_v56  ;;  %v1916_v54 = vmul.f32 %v1914_v24, %v1914_v24 }
0x15c4   :  { %v1915_v57 = vsub.f32 %v1905_v50, %v1913_v13  ;;  %v1918_v58 = vsel %vm63_vm0, %v1916_v54, 0.0 }
0x15c5   :  { %1919 = vadd.xlane.f32.xlu1 %v1918_v58 }
0x15c6   :  { %v1917_v59 = vmul.f32 %v1915_v57, %v1915_v57 }
0x15c8   :  { %v1921_v60 = vsel %vm63_vm0, %v1917_v59, 0.0 }
0x15c9   :  { %1922 = vadd.xlane.f32.xlu0 %v1921_v60 }
0x164e   :  { %v1920_v3 = vpop.xlane.xlu1 %1919 }
0x164f   :  { %v1924_v4 = vmul.f32 0.03125, %v1920_v3 }
0x1651   :  { %v1926_v29 = vadd.f32 1e-12, %v1924_v4 }
0x1652   :  { %v1923_v5 = vpop.xlane.xlu0 %1922 }
0x1653   :  { %2557 = vrsqrt.f32 %v1926_v29  ;;  %v1925_v6 = vmul.f32 0.03125, %v1923_v5 }
0x1655   :  { %v1927_v7 = vadd.f32 1e-12, %v1925_v6 }
0x1657   :  { %2559 = vrsqrt.f32 %v1927_v7 }
0x1660   :  { %v2558_v10 = vpop.eup %2557 }
0x1661   :  { %v1930_v12 = vmul.f32 %v2558_v10, %v1914_v24 }
0x1663   :  { %v1936_v37 = vmul.f32 %v1935_v9, %v1930_v12 }
0x1664   :  { %v2560_v15 = vpop.eup %2559 }
0x1665   :  { %v1931_v17 = vmul.f32 %v2560_v15, %v1915_v57  ;;  %v1942_v19 = vadd.f32 %v1941_v14, %v1936_v37 }
0x1667   :  { %v1937_v18 = vmul.f32 %v1935_v9, %v1931_v17  ;;  %v1944_v61 = vpack.c.bf16 %v1942_v19, %v1942_v19 }
0x1669   :  { %v1943_v63 = vadd.f32 %v1941_v14, %v1937_v18  ;;  %v1956_v23 = vunpack.c.l.b16 %v1944_v61 }
0x166b   :  { %v1945_v20 = vpack.c.bf16 %v1943_v63, %v1943_v63 }
0x166d   :  { %v1957_v21 = vunpack.c.l.b16 %v1945_v20 }
0x166f   :  { %v1958_v27 = vrot.slane %v1957_v21, 7 }
0x1671   :  { %v1960_v36 = vsel %vm1959_vm11, %v1958_v27, %v1956_v23 }
0x1672   :  { %v1961_v28 = vpack.c.b16 %v1960_v36, %v1960_v36 }
0x1674   :  { %2388 = vmatmul.mubr.msk.bf16.vlgmr.msra.gmra.mxu1 %vm63_vm0, %v1961_v28 }
0x1734   :  { %v2011_v31 = vpop.f32.mrf.mxu1 }
0x1735   :  { %v2012_v32 = vadd.f32 %v2011_v31, %v1953_v25 }
0x1736   :  { %v2389_v30 = vpop.f32.mrf.mxu1 }
0x1737   :  { %2561 = vtanh.f32 %v2012_v32 }
0x1738   :  { %v2014_v33 = vpop.f32.mrf.mxu1 }
0x173a   :  { %v2390_v34 = vpop.f32.mrf.mxu1 }
0x1744   :  { %v2562_v35 = vpop.eup %2561 }
0x1745   :  { %v2022_v26 = vmul.f32 %v2562_v35, %v2021_v51 }
0x1747   :  { %v2024_v41 = vsel %vm2023_vm12, %v2022_v26, 0.0 }
0x1748   :  { %2025 = vadd.xlane.f32.xlu0 %v2024_v41 }
0x17d1   :  { %v2026_v43 = vpop.xlane.xlu0 %2025 }
0x17d2   :  { %v2031_v38 = vadd.f32 %v2030_v42, %v2026_v43 }
0x17d4   :  { %v2127_v0 = vmul.f32 -1.442695, %v2031_v38 }
0x17d6   :  { %2563 = vpow2.f32 %v2127_v0 }
0x17e3   :  { %v2564_v39 = vpop.eup %2563 }
0x17e4   :  { %v2035_v44 = vadd.f32 1.0, %v2564_v39 }
0x17e6   :  { %2565 = vrcp.f32 %v2035_v44 }
0x17f3   :  { %v2566_v45 = vpop.eup %2565 }
0x17f4   :  { %v2038_v1 = vmul.f32 4.0, %v2566_v45 }
0x17f6   :  { %v2039_v11 = vadd.f32 1.0, %v2038_v1 }
0x17f8   :  { %2041 = vst.msk [vmem:[%s3122_s8] sm:$0x3] %vm2040_vm13, %v2039_v11 }

</bundles_post_ra>
